<compile_context>
chip_gen: v5e
topology: v5e:2x2
jax: 0.10.0
libtpu: 0.0.40
codegen_flags: <defaults>
</compile_context>

<pallas_src>
import functools

import jax
import jax.numpy as jnp
import numpy as np
from jax.experimental import pallas as pl
from jax.experimental.pallas import tpu as pltpu

# Keep XLA-reference and in-kernel MXU matmuls numerically comparable.
jax.config.update("jax_default_matmul_precision", "highest")


# ----------------------------- fused Pallas kernel ---------------------------


def _fused_model_kernel(
    str_attr_ref, str_adj_ref, con_attr_ref, con_adj_ref,
    w_str_ref, b_str_ref, w_con_ref, b_con_ref,
    w_dec_ref, b_dec_ref, w_d1_ref, w_d2_ref,
    alphas_ref, dbias_ref,
    subhat_ref, ret1_ref, ret2_ref,
    *, batch, subgraph_size, negsamp_round):
  """Entire Model.forward for the whole (small) batch in one invocation."""
  B = batch
  S = subgraph_size
  N = str_attr_ref.shape[1]
  Mn = con_attr_ref.shape[1]
  n_in = str_attr_ref.shape[2]
  n_h = w_str_ref.shape[1]

  w_str = w_str_ref[...]
  b_str = b_str_ref[...]          # (1, n_h)
  w_con = w_con_ref[...]
  b_con = b_con_ref[...]
  w_dec = w_dec_ref[...]
  b_dec = b_dec_ref[...]
  w_d1 = w_d1_ref[...]
  w_d2 = w_d2_ref[...]
  a_str = alphas_ref[0]           # PReLU alphas (SMEM scalars)
  a_con = alphas_ref[1]
  a_dec = alphas_ref[2]
  b_d1 = dbias_ref[0]             # bilinear biases (SMEM scalars)
  b_d2 = dbias_ref[1]

  def prelu(x, a):
    return jnp.where(x > 0, x, a * x)

  # ---- batched linear transforms: one MXU matmul per weight matrix ----
  x_s_all = str_attr_ref[...].reshape(B * N, n_in)
  seq_s_all = jnp.dot(x_s_all, w_str,
                      preferred_element_type=jnp.float32)    # (B*N, n_h)
  x_c_all = con_attr_ref[...].reshape(B * Mn, n_in)
  seq_c_all = jnp.dot(x_c_all, w_con,
                      preferred_element_type=jnp.float32)    # (B*M, n_h)

  # ---- per-sample adjacency matmuls (distinct adj per batch item) ----
  h1_list, h2_list = [], []
  for b in range(B):
    adj_s = str_adj_ref[b]                                   # (N, N)
    h1 = prelu(
        jnp.dot(adj_s, seq_s_all[b * N:(b + 1) * N, :],
                preferred_element_type=jnp.float32) + b_str, a_str)
    h1_list.append(h1)                                       # (N, n_h)

    adj_c = con_adj_ref[b]                                   # (M, M)
    h2 = prelu(
        jnp.dot(adj_c, seq_c_all[b * Mn:(b + 1) * Mn, :],
                preferred_element_type=jnp.float32) + b_con, a_con)
    h2_list.append(h2)                                       # (M, n_h)

  # ---- Structure_Decoder (dropout rate 0.0 -> identity) ----
  h1_sub_all = jnp.concatenate([h1[:S, :] for h1 in h1_list], axis=0)
  seq_d_all = jnp.dot(h1_sub_all, w_dec,
                      preferred_element_type=jnp.float32)    # (B*S, n_h)
  subhat_list = []
  for b in range(B):
    adj_sub = str_adj_ref[b][:S, :S]                         # (S, S)
    x_d = prelu(
        jnp.dot(adj_sub, seq_d_all[b * S:(b + 1) * S, :],
                preferred_element_type=jnp.float32) + b_dec, a_dec)
    x_d = jnp.maximum(x_d, 0.0)                              # F.relu
    # A_hat = x @ x.T  via dot_general contracting last dims (no transpose).
    subhat_list.append(jax.lax.dot_general(
        x_d, x_d, (((1,), (1,)), ((), ())),
        preferred_element_type=jnp.float32))                 # (S, S)
  subhat_ref[...] = jnp.stack(subhat_list, axis=0)           # single store

  # ---- avg readouts & node picks ----
  c1 = jnp.concatenate(
      [jnp.mean(h1[:S, :], axis=0, keepdims=True) for h1 in h1_list], axis=0)
  h_mv1 = jnp.concatenate([h1[S - 1:S, :] for h1 in h1_list], axis=0)
  c2 = jnp.concatenate(
      [jnp.mean(h2[:Mn - 1, :], axis=0, keepdims=True) for h2 in h2_list],
      axis=0)
  h_mv2 = jnp.concatenate([h2[Mn - 1:Mn, :] for h2 in h2_list], axis=0)
  h_pos = jnp.concatenate([h1[N - 2:N - 1, :] for h1 in h1_list], axis=0)
  h_neg = jnp.concatenate([h1[N - 1:N, :] for h1 in h1_list], axis=0)

  a_mix = 0.1
  candhmv = a_mix * c1 + (1.0 - a_mix) * h_mv1

  # ---- Con_Discriminator (disc2): one h@W, all negsamp rounds scored here ----
  hw2 = jnp.dot(h_mv2, w_d2, preferred_element_type=jnp.float32)  # (B, n_h)
  sc2 = [jnp.sum(hw2 * c2, axis=-1, keepdims=True) + b_d2]
  c_mi = c2
  for _ in range(negsamp_round):
    # torch: c_mi = cat((c_mi[-2:-1, :], c_mi[:-1, :]), 0)   (static roll)
    c_mi = jnp.concatenate([c_mi[B - 2:B - 1, :], c_mi[:B - 1, :]], axis=0)
    sc2.append(jnp.sum(hw2 * c_mi, axis=-1, keepdims=True) + b_d2)
  ret2_ref[...] = jnp.concatenate(sc2, axis=0)               # single store

  # ---- Str_Discriminator (disc1), mode='train': shared h@W matmul ----
  hw12 = jnp.dot(jnp.concatenate([h_pos, h_neg], axis=0), w_d1,
                 preferred_element_type=jnp.float32)         # (2B, n_h)
  hw_pos = hw12[:B, :]
  hw_neg = hw12[B:, :]
  sc1_pos = jnp.sum(hw_pos * candhmv, axis=-1, keepdims=True) + b_d1
  sc1_neg = jnp.sum(hw_neg * candhmv, axis=-1, keepdims=True) + b_d1
  ret1_ref[...] = jnp.concatenate(
      [sc1_pos] + [sc1_neg] * negsamp_round, axis=0)         # single store


# ------------------------------- model forward -------------------------------


@functools.partial(jax.jit, static_argnames=("subgraph_size", "negsamp_round"))
def model_forward(params, str_attr, str_adj, con_attr, con_adj,
                  subgraph_size, negsamp_round):
  B, N, n_in = str_attr.shape
  _, Mn, _ = con_attr.shape
  n_h = params["W_str"].shape[1]
  S = subgraph_size
  n_sc = (negsamp_round + 1) * B

  alphas = jnp.concatenate(
      [params["alpha_str"], params["alpha_con"], params["alpha_dec"]]
  ).astype(jnp.float32)                                        # (3,) SMEM
  dbias = jnp.concatenate(
      [params["b_disc1"], params["b_disc2"]]).astype(jnp.float32)  # (2,) SMEM

  kernel = functools.partial(
      _fused_model_kernel, batch=B, subgraph_size=S,
      negsamp_round=negsamp_round)

  flops = B * (
      2 * N * n_in * n_h + 2 * N * N * n_h          # Structure GCN
      + 2 * Mn * n_in * n_h + 2 * Mn * Mn * n_h     # Context GCN
      + 2 * S * n_h * n_h + 2 * S * S * n_h + 2 * S * n_h * S)  # decoder
  flops += 3 * 2 * B * n_h * n_h + (negsamp_round + 1) * 4 * B * n_h  # discs
  bytes_accessed = 4 * (
      B * N * n_in + B * N * N + B * Mn * n_in + B * Mn * Mn
      + 2 * n_in * n_h + 3 * n_h * n_h + 3 * n_h + 5
      + B * S * S + 2 * n_sc)

  vmem = pl.BlockSpec(memory_space=pltpu.MemorySpace.VMEM)
  smem = pl.BlockSpec(memory_space=pltpu.MemorySpace.SMEM)

  sub_hat, ret1, ret2 = pl.pallas_call(
      kernel,
      out_shape=(
          jax.ShapeDtypeStruct((B, S, S), jnp.float32),
          jax.ShapeDtypeStruct((n_sc, 1), jnp.float32),
          jax.ShapeDtypeStruct((n_sc, 1), jnp.float32),
      ),
      in_specs=[vmem] * 12 + [smem, smem],
      out_specs=(vmem, vmem, vmem),
      cost_estimate=pl.CostEstimate(
          flops=flops, transcendentals=0, bytes_accessed=bytes_accessed),
  )(str_attr, str_adj, con_attr, con_adj,
    params["W_str"], params["b_str"].reshape(1, n_h),
    params["W_con"], params["b_con"].reshape(1, n_h),
    params["W_dec"], params["b_dec"].reshape(1, n_h),
    params["W_disc1"], params["W_disc2"],
    alphas, dbias)

  return ret1, ret2, sub_hat


# ----------------------------- pure-JAX reference ----------------------------


def model_forward_ref(params, str_attr, str_adj, con_attr, con_adj,
                      subgraph_size, negsamp_round):
  def gcn(attr, adj, w, b, alpha):
    seq = jnp.einsum("bnf,fh->bnh", attr, w)
    y = jnp.einsum("bnm,bmh->bnh", adj, seq) + b
    return jnp.where(y > 0, y, alpha * y)

  S = subgraph_size
  h1 = gcn(str_attr, str_adj, params["W_str"], params["b_str"],
           params["alpha_str"][0])
  h2 = gcn(con_attr, con_adj, params["W_con"], params["b_con"],
           params["alpha_con"][0])
  x = gcn(h1[:, :S, :], str_adj[:, :S, :S], params["W_dec"], params["b_dec"],
          params["alpha_dec"][0])
  x = jnp.maximum(x, 0.0)
  sub_hat = jnp.einsum("bik,bjk->bij", x, x)

  c1 = jnp.mean(h1[:, :S, :], axis=1)
  h_mv1 = h1[:, S - 1, :]
  c2 = jnp.mean(h2[:, :-1, :], axis=1)
  h_mv2 = h2[:, -1, :]
  candhmv = 0.1 * c1 + 0.9 * h_mv1
  h_neb = h1[:, S:, :]

  def bilinear(h, c, w, b):
    return jnp.sum((h @ w) * c, axis=-1, keepdims=True) + b

  scs2 = [bilinear(h_mv2, c2, params["W_disc2"], params["b_disc2"])]
  c_mi = c2
  for _ in range(negsamp_round):
    c_mi = jnp.concatenate([c_mi[-2:-1, :], c_mi[:-1, :]], axis=0)
    scs2.append(bilinear(h_mv2, c_mi, params["W_disc2"], params["b_disc2"]))
  ret2 = jnp.concatenate(scs2, axis=0)

  h_pos = h_neb[:, -2, :]
  h_neg = h_neb[:, -1, :]
  scs1 = [bilinear(h_pos, candhmv, params["W_disc1"], params["b_disc1"])]
  for _ in range(negsamp_round):
    scs1.append(bilinear(h_neg, candhmv, params["W_disc1"], params["b_disc1"]))
  ret1 = jnp.concatenate(scs1, axis=0)
  return ret1, ret2, sub_hat


# --------------------------------- parameters --------------------------------


def _xavier_uniform(key, shape, fan_in, fan_out):
  bound = (6.0 / (fan_in + fan_out)) ** 0.5
  return jax.random.uniform(key, shape, jnp.float32, -bound, bound)


def init_params(key, n_in, n_h):
  ks = jax.random.split(key, 5)
  return dict(
      # GCN "Structure"
      W_str=_xavier_uniform(ks[0], (n_in, n_h), n_in, n_h),
      b_str=jnp.zeros((n_h,), jnp.float32),
      alpha_str=jnp.array([0.25], jnp.float32),
      # GCN "Context"
      W_con=_xavier_uniform(ks[1], (n_in, n_h), n_in, n_h),
      b_con=jnp.zeros((n_h,), jnp.float32),
      alpha_con=jnp.array([0.25], jnp.float32),
      # Structure_Decoder.gc1
      W_dec=_xavier_uniform(ks[2], (n_h, n_h), n_h, n_h),
      b_dec=jnp.zeros((n_h,), jnp.float32),
      alpha_dec=jnp.array([0.25], jnp.float32),
      # Str_Discriminator bilinear (out_features=1)
      W_disc1=_xavier_uniform(ks[3], (n_h, n_h), n_h * n_h, n_h),
      b_disc1=jnp.zeros((1,), jnp.float32),
      # Con_Discriminator bilinear
      W_disc2=_xavier_uniform(ks[4], (n_h, n_h), n_h * n_h, n_h),
      b_disc2=jnp.zeros((1,), jnp.float32),
  )


# ------------------------------------ main ------------------------------------


if __name__ == "__main__":
  B, N, M = 2, 8, 8
  n_in, n_h = 16, 32
  subgraph_size, negsamp_round = 4, 2

  key = jax.random.PRNGKey(0)
  k_par, k1, k2, k3, k4 = jax.random.split(key, 5)
  params = init_params(k_par, n_in, n_h)

  str_attr = jax.random.normal(k1, (B, N, n_in), jnp.float32)
  con_attr = jax.random.normal(k2, (B, M, n_in), jnp.float32)
  # dense row-stochastic-ish adjacencies
  str_adj = jax.nn.softmax(jax.random.normal(k3, (B, N, N), jnp.float32), -1)
  con_adj = jax.nn.softmax(jax.random.normal(k4, (B, M, M), jnp.float32), -1)

  ret1, ret2, sub_hat = model_forward(
      params, str_attr, str_adj, con_attr, con_adj,
      subgraph_size=subgraph_size, negsamp_round=negsamp_round)
  jax.block_until_ready((ret1, ret2, sub_hat))

  assert ret1.shape == ((negsamp_round + 1) * B, 1)
  assert ret2.shape == ((negsamp_round + 1) * B, 1)
  assert sub_hat.shape == (B, subgraph_size, subgraph_size)

  r1_ref, r2_ref, sh_ref = model_forward_ref(
      params, str_attr, str_adj, con_attr, con_adj,
      subgraph_size, negsamp_round)
  np.testing.assert_allclose(np.asarray(ret1), np.asarray(r1_ref),
                             rtol=2e-3, atol=2e-3)
  np.testing.assert_allclose(np.asarray(ret2), np.asarray(r2_ref),
                             rtol=2e-3, atol=2e-3)
  np.testing.assert_allclose(np.asarray(sub_hat), np.asarray(sh_ref),
                             rtol=2e-3, atol=2e-3)

  print("KERNEL_OK")
</pallas_src>

<mosaic_0001>
module attributes {stable_mosaic.version = 11 : i64} {
  func.func @_fused_model_kernel(%arg0: memref<2x8x16xf32, #tpu.memory_space<vmem>>, %arg1: memref<2x8x8xf32, #tpu.memory_space<vmem>>, %arg2: memref<2x8x16xf32, #tpu.memory_space<vmem>>, %arg3: memref<2x8x8xf32, #tpu.memory_space<vmem>>, %arg4: memref<16x32xf32, #tpu.memory_space<vmem>>, %arg5: memref<1x32xf32, #tpu.memory_space<vmem>>, %arg6: memref<16x32xf32, #tpu.memory_space<vmem>>, %arg7: memref<1x32xf32, #tpu.memory_space<vmem>>, %arg8: memref<32x32xf32, #tpu.memory_space<vmem>>, %arg9: memref<1x32xf32, #tpu.memory_space<vmem>>, %arg10: memref<32x32xf32, #tpu.memory_space<vmem>>, %arg11: memref<32x32xf32, #tpu.memory_space<vmem>>, %arg12: memref<3xf32, #tpu.memory_space<smem>>, %arg13: memref<2xf32, #tpu.memory_space<smem>>, %arg14: memref<2x4x4xf32, #tpu.memory_space<vmem>>, %arg15: memref<6x1xf32, #tpu.memory_space<vmem>>, %arg16: memref<6x1xf32, #tpu.memory_space<vmem>>) attributes {dimension_semantics = [], scalar_prefetch = 0 : i64, scratch_operands = 0 : i64, tpu.core_type = #tpu.core_type<tc>} {
    %c0 = arith.constant 0 : index
    %c0_0 = arith.constant 0 : index
    %0 = vector.load %arg4[%c0, %c0_0] : memref<16x32xf32, #tpu.memory_space<vmem>>, vector<16x32xf32>
    %c0_1 = arith.constant 0 : index
    %c0_2 = arith.constant 0 : index
    %1 = vector.load %arg5[%c0_1, %c0_2] : memref<1x32xf32, #tpu.memory_space<vmem>>, vector<1x32xf32>
    %c0_3 = arith.constant 0 : index
    %c0_4 = arith.constant 0 : index
    %2 = vector.load %arg6[%c0_3, %c0_4] : memref<16x32xf32, #tpu.memory_space<vmem>>, vector<16x32xf32>
    %c0_5 = arith.constant 0 : index
    %c0_6 = arith.constant 0 : index
    %3 = vector.load %arg7[%c0_5, %c0_6] : memref<1x32xf32, #tpu.memory_space<vmem>>, vector<1x32xf32>
    %c0_7 = arith.constant 0 : index
    %c0_8 = arith.constant 0 : index
    %4 = vector.load %arg8[%c0_7, %c0_8] : memref<32x32xf32, #tpu.memory_space<vmem>>, vector<32x32xf32>
    %c0_9 = arith.constant 0 : index
    %c0_10 = arith.constant 0 : index
    %5 = vector.load %arg9[%c0_9, %c0_10] : memref<1x32xf32, #tpu.memory_space<vmem>>, vector<1x32xf32>
    %c0_11 = arith.constant 0 : index
    %c0_12 = arith.constant 0 : index
    %6 = vector.load %arg10[%c0_11, %c0_12] : memref<32x32xf32, #tpu.memory_space<vmem>>, vector<32x32xf32>
    %c0_13 = arith.constant 0 : index
    %c0_14 = arith.constant 0 : index
    %7 = vector.load %arg11[%c0_13, %c0_14] : memref<32x32xf32, #tpu.memory_space<vmem>>, vector<32x32xf32>
    %c0_15 = arith.constant 0 : index
    %8 = memref.load %arg12[%c0_15] : memref<3xf32, #tpu.memory_space<smem>>
    %c1 = arith.constant 1 : index
    %9 = memref.load %arg12[%c1] : memref<3xf32, #tpu.memory_space<smem>>
    %c2 = arith.constant 2 : index
    %10 = memref.load %arg12[%c2] : memref<3xf32, #tpu.memory_space<smem>>
    %c0_16 = arith.constant 0 : index
    %11 = memref.load %arg13[%c0_16] : memref<2xf32, #tpu.memory_space<smem>>
    %c1_17 = arith.constant 1 : index
    %12 = memref.load %arg13[%c1_17] : memref<2xf32, #tpu.memory_space<smem>>
    %c0_18 = arith.constant 0 : index
    %c0_19 = arith.constant 0 : index
    %c0_20 = arith.constant 0 : index
    %13 = vector.load %arg0[%c0_18, %c0_19, %c0_20] : memref<2x8x16xf32, #tpu.memory_space<vmem>>, vector<2x8x16xf32>
    %14 = vector.shape_cast %13 : vector<2x8x16xf32> to vector<16x16xf32>
    %cst = arith.constant dense<0.000000e+00> : vector<16x32xf32>
    %15 = tpu.matmul %14, %0, %cst {dimension_numbers = #tpu.dot_dimension_numbers<[1], [0], [0], [1], [0, 0, 1, 1], [], []>, precision = #tpu.contract_precision<fp32>} : vector<16x16xf32>, vector<16x32xf32>, vector<16x32xf32> -> vector<16x32xf32>
    %c0_21 = arith.constant 0 : index
    %c0_22 = arith.constant 0 : index
    %c0_23 = arith.constant 0 : index
    %16 = vector.load %arg2[%c0_21, %c0_22, %c0_23] : memref<2x8x16xf32, #tpu.memory_space<vmem>>, vector<2x8x16xf32>
    %17 = vector.shape_cast %16 : vector<2x8x16xf32> to vector<16x16xf32>
    %cst_24 = arith.constant dense<0.000000e+00> : vector<16x32xf32>
    %18 = tpu.matmul %17, %2, %cst_24 {dimension_numbers = #tpu.dot_dimension_numbers<[1], [0], [0], [1], [0, 0, 1, 1], [], []>, precision = #tpu.contract_precision<fp32>} : vector<16x16xf32>, vector<16x32xf32>, vector<16x32xf32> -> vector<16x32xf32>
    %c0_25 = arith.constant 0 : index
    %c0_26 = arith.constant 0 : index
    %c0_27 = arith.constant 0 : index
    %19 = vector.load %arg1[%c0_25, %c0_26, %c0_27] : memref<2x8x8xf32, #tpu.memory_space<vmem>>, vector<1x8x8xf32>
    %20 = vector.shape_cast %19 : vector<1x8x8xf32> to vector<8x8xf32>
    %21 = vector.extract_strided_slice %15 {offsets = [0, 0], sizes = [8, 32], strides = [1, 1]} : vector<16x32xf32> to vector<8x32xf32>
    %cst_28 = arith.constant dense<0.000000e+00> : vector<8x32xf32>
    %22 = tpu.matmul %20, %21, %cst_28 {dimension_numbers = #tpu.dot_dimension_numbers<[1], [0], [0], [1], [0, 0, 1, 1], [], []>, precision = #tpu.contract_precision<fp32>} : vector<8x8xf32>, vector<8x32xf32>, vector<8x32xf32> -> vector<8x32xf32>
    %23 = vector.broadcast %1 : vector<1x32xf32> to vector<8x32xf32>
    %24 = arith.addf %22, %23 : vector<8x32xf32>
    %cst_29 = arith.constant 0.000000e+00 : f32
    %25 = vector.broadcast %cst_29 : f32 to vector<8x32xf32>
    %26 = arith.cmpf ogt, %24, %25 : vector<8x32xf32>
    %27 = vector.broadcast %8 : f32 to vector<8x32xf32>
    %28 = arith.mulf %27, %24 : vector<8x32xf32>
    %29 = arith.select %26, %24, %28 : vector<8x32xi1>, vector<8x32xf32>
    %c0_30 = arith.constant 0 : index
    %c0_31 = arith.constant 0 : index
    %c0_32 = arith.constant 0 : index
    %30 = vector.load %arg3[%c0_30, %c0_31, %c0_32] : memref<2x8x8xf32, #tpu.memory_space<vmem>>, vector<1x8x8xf32>
    %31 = vector.shape_cast %30 : vector<1x8x8xf32> to vector<8x8xf32>
    %32 = vector.extract_strided_slice %18 {offsets = [0, 0], sizes = [8, 32], strides = [1, 1]} : vector<16x32xf32> to vector<8x32xf32>
    %cst_33 = arith.constant dense<0.000000e+00> : vector<8x32xf32>
    %33 = tpu.matmul %31, %32, %cst_33 {dimension_numbers = #tpu.dot_dimension_numbers<[1], [0], [0], [1], [0, 0, 1, 1], [], []>, precision = #tpu.contract_precision<fp32>} : vector<8x8xf32>, vector<8x32xf32>, vector<8x32xf32> -> vector<8x32xf32>
    %34 = vector.broadcast %3 : vector<1x32xf32> to vector<8x32xf32>
    %35 = arith.addf %33, %34 : vector<8x32xf32>
    %cst_34 = arith.constant 0.000000e+00 : f32
    %36 = vector.broadcast %cst_34 : f32 to vector<8x32xf32>
    %37 = arith.cmpf ogt, %35, %36 : vector<8x32xf32>
    %38 = vector.broadcast %9 : f32 to vector<8x32xf32>
    %39 = arith.mulf %38, %35 : vector<8x32xf32>
    %40 = arith.select %37, %35, %39 : vector<8x32xi1>, vector<8x32xf32>
    %c1_35 = arith.constant 1 : index
    %c0_36 = arith.constant 0 : index
    %c0_37 = arith.constant 0 : index
    %41 = vector.load %arg1[%c1_35, %c0_36, %c0_37] : memref<2x8x8xf32, #tpu.memory_space<vmem>>, vector<1x8x8xf32>
    %42 = vector.shape_cast %41 : vector<1x8x8xf32> to vector<8x8xf32>
    %43 = vector.extract_strided_slice %15 {offsets = [8, 0], sizes = [8, 32], strides = [1, 1]} : vector<16x32xf32> to vector<8x32xf32>
    %cst_38 = arith.constant dense<0.000000e+00> : vector<8x32xf32>
    %44 = tpu.matmul %42, %43, %cst_38 {dimension_numbers = #tpu.dot_dimension_numbers<[1], [0], [0], [1], [0, 0, 1, 1], [], []>, precision = #tpu.contract_precision<fp32>} : vector<8x8xf32>, vector<8x32xf32>, vector<8x32xf32> -> vector<8x32xf32>
    %45 = vector.broadcast %1 : vector<1x32xf32> to vector<8x32xf32>
    %46 = arith.addf %44, %45 : vector<8x32xf32>
    %cst_39 = arith.constant 0.000000e+00 : f32
    %47 = vector.broadcast %cst_39 : f32 to vector<8x32xf32>
    %48 = arith.cmpf ogt, %46, %47 : vector<8x32xf32>
    %49 = vector.broadcast %8 : f32 to vector<8x32xf32>
    %50 = arith.mulf %49, %46 : vector<8x32xf32>
    %51 = arith.select %48, %46, %50 : vector<8x32xi1>, vector<8x32xf32>
    %c1_40 = arith.constant 1 : index
    %c0_41 = arith.constant 0 : index
    %c0_42 = arith.constant 0 : index
    %52 = vector.load %arg3[%c1_40, %c0_41, %c0_42] : memref<2x8x8xf32, #tpu.memory_space<vmem>>, vector<1x8x8xf32>
    %53 = vector.shape_cast %52 : vector<1x8x8xf32> to vector<8x8xf32>
    %54 = vector.extract_strided_slice %18 {offsets = [8, 0], sizes = [8, 32], strides = [1, 1]} : vector<16x32xf32> to vector<8x32xf32>
    %cst_43 = arith.constant dense<0.000000e+00> : vector<8x32xf32>
    %55 = tpu.matmul %53, %54, %cst_43 {dimension_numbers = #tpu.dot_dimension_numbers<[1], [0], [0], [1], [0, 0, 1, 1], [], []>, precision = #tpu.contract_precision<fp32>} : vector<8x8xf32>, vector<8x32xf32>, vector<8x32xf32> -> vector<8x32xf32>
    %56 = vector.broadcast %3 : vector<1x32xf32> to vector<8x32xf32>
    %57 = arith.addf %55, %56 : vector<8x32xf32>
    %cst_44 = arith.constant 0.000000e+00 : f32
    %58 = vector.broadcast %cst_44 : f32 to vector<8x32xf32>
    %59 = arith.cmpf ogt, %57, %58 : vector<8x32xf32>
    %60 = vector.broadcast %9 : f32 to vector<8x32xf32>
    %61 = arith.mulf %60, %57 : vector<8x32xf32>
    %62 = arith.select %59, %57, %61 : vector<8x32xi1>, vector<8x32xf32>
    %63 = vector.extract_strided_slice %29 {offsets = [0, 0], sizes = [4, 32], strides = [1, 1]} : vector<8x32xf32> to vector<4x32xf32>
    %64 = vector.extract_strided_slice %51 {offsets = [0, 0], sizes = [4, 32], strides = [1, 1]} : vector<8x32xf32> to vector<4x32xf32>
    %65 = tpu.concatenate %63, %64 in 0 : vector<4x32xf32>, vector<4x32xf32> -> vector<8x32xf32>
    %cst_45 = arith.constant dense<0.000000e+00> : vector<8x32xf32>
    %66 = tpu.matmul %65, %4, %cst_45 {dimension_numbers = #tpu.dot_dimension_numbers<[1], [0], [0], [1], [0, 0, 1, 1], [], []>, precision = #tpu.contract_precision<fp32>} : vector<8x32xf32>, vector<32x32xf32>, vector<8x32xf32> -> vector<8x32xf32>
    %c0_46 = arith.constant 0 : index
    %c0_47 = arith.constant 0 : index
    %c0_48 = arith.constant 0 : index
    %67 = vector.load %arg1[%c0_46, %c0_47, %c0_48] : memref<2x8x8xf32, #tpu.memory_space<vmem>>, vector<1x8x8xf32>
    %68 = vector.shape_cast %67 : vector<1x8x8xf32> to vector<8x8xf32>
    %69 = vector.extract_strided_slice %68 {offsets = [0, 0], sizes = [4, 4], strides = [1, 1]} : vector<8x8xf32> to vector<4x4xf32>
    %70 = vector.extract_strided_slice %66 {offsets = [0, 0], sizes = [4, 32], strides = [1, 1]} : vector<8x32xf32> to vector<4x32xf32>
    %cst_49 = arith.constant dense<0.000000e+00> : vector<4x32xf32>
    %71 = tpu.matmul %69, %70, %cst_49 {dimension_numbers = #tpu.dot_dimension_numbers<[1], [0], [0], [1], [0, 0, 1, 1], [], []>, precision = #tpu.contract_precision<fp32>} : vector<4x4xf32>, vector<4x32xf32>, vector<4x32xf32> -> vector<4x32xf32>
    %72 = vector.broadcast %5 : vector<1x32xf32> to vector<4x32xf32>
    %73 = arith.addf %71, %72 : vector<4x32xf32>
    %cst_50 = arith.constant 0.000000e+00 : f32
    %74 = vector.broadcast %cst_50 : f32 to vector<4x32xf32>
    %75 = arith.cmpf ogt, %73, %74 : vector<4x32xf32>
    %76 = vector.broadcast %10 : f32 to vector<4x32xf32>
    %77 = arith.mulf %76, %73 : vector<4x32xf32>
    %78 = arith.select %75, %73, %77 : vector<4x32xi1>, vector<4x32xf32>
    %cst_51 = arith.constant 0.000000e+00 : f32
    %79 = vector.broadcast %cst_51 : f32 to vector<4x32xf32>
    %80 = arith.maximumf %78, %79 : vector<4x32xf32>
    %cst_52 = arith.constant dense<0.000000e+00> : vector<4x4xf32>
    %81 = tpu.matmul %80, %80, %cst_52 {dimension_numbers = #tpu.dot_dimension_numbers<[1], [1], [0], [0], [0, 0, 1, 0], [], []>, precision = #tpu.contract_precision<fp32>} : vector<4x32xf32>, vector<4x32xf32>, vector<4x4xf32> -> vector<4x4xf32>
    %c1_53 = arith.constant 1 : index
    %c0_54 = arith.constant 0 : index
    %c0_55 = arith.constant 0 : index
    %82 = vector.load %arg1[%c1_53, %c0_54, %c0_55] : memref<2x8x8xf32, #tpu.memory_space<vmem>>, vector<1x8x8xf32>
    %83 = vector.shape_cast %82 : vector<1x8x8xf32> to vector<8x8xf32>
    %84 = vector.extract_strided_slice %83 {offsets = [0, 0], sizes = [4, 4], strides = [1, 1]} : vector<8x8xf32> to vector<4x4xf32>
    %85 = vector.extract_strided_slice %66 {offsets = [4, 0], sizes = [4, 32], strides = [1, 1]} : vector<8x32xf32> to vector<4x32xf32>
    %cst_56 = arith.constant dense<0.000000e+00> : vector<4x32xf32>
    %86 = tpu.matmul %84, %85, %cst_56 {dimension_numbers = #tpu.dot_dimension_numbers<[1], [0], [0], [1], [0, 0, 1, 1], [], []>, precision = #tpu.contract_precision<fp32>} : vector<4x4xf32>, vector<4x32xf32>, vector<4x32xf32> -> vector<4x32xf32>
    %87 = vector.broadcast %5 : vector<1x32xf32> to vector<4x32xf32>
    %88 = arith.addf %86, %87 : vector<4x32xf32>
    %cst_57 = arith.constant 0.000000e+00 : f32
    %89 = vector.broadcast %cst_57 : f32 to vector<4x32xf32>
    %90 = arith.cmpf ogt, %88, %89 : vector<4x32xf32>
    %91 = vector.broadcast %10 : f32 to vector<4x32xf32>
    %92 = arith.mulf %91, %88 : vector<4x32xf32>
    %93 = arith.select %90, %88, %92 : vector<4x32xi1>, vector<4x32xf32>
    %cst_58 = arith.constant 0.000000e+00 : f32
    %94 = vector.broadcast %cst_58 : f32 to vector<4x32xf32>
    %95 = arith.maximumf %93, %94 : vector<4x32xf32>
    %cst_59 = arith.constant dense<0.000000e+00> : vector<4x4xf32>
    %96 = tpu.matmul %95, %95, %cst_59 {dimension_numbers = #tpu.dot_dimension_numbers<[1], [1], [0], [0], [0, 0, 1, 0], [], []>, precision = #tpu.contract_precision<fp32>} : vector<4x32xf32>, vector<4x32xf32>, vector<4x4xf32> -> vector<4x4xf32>
    %97 = vector.shape_cast %81 : vector<4x4xf32> to vector<1x4x4xf32>
    %98 = vector.shape_cast %96 : vector<4x4xf32> to vector<1x4x4xf32>
    %99 = tpu.concatenate %97, %98 in 0 : vector<1x4x4xf32>, vector<1x4x4xf32> -> vector<2x4x4xf32>
    %c0_60 = arith.constant 0 : index
    %c0_61 = arith.constant 0 : index
    %c0_62 = arith.constant 0 : index
    %100 = vector.load %arg14[%c0_60, %c0_61, %c0_62] : memref<2x4x4xf32, #tpu.memory_space<vmem>>, vector<2x4x4xf32>
    tpu.vector_store %arg14[%c0_60, %c0_61, %c0_62], %99 {strides = array<i32>} : memref<2x4x4xf32, #tpu.memory_space<vmem>>, vector<2x4x4xf32>,
    %101 = vector.extract_strided_slice %29 {offsets = [0, 0], sizes = [4, 32], strides = [1, 1]} : vector<8x32xf32> to vector<4x32xf32>
    %cst_63 = arith.constant dense<0.000000e+00> : vector<32xf32>
    %102 = vector.multi_reduction <add>, %101, %cst_63 [0] : vector<4x32xf32> to vector<32xf32>
    %103 = vector.shape_cast %102 : vector<32xf32> to vector<1x32xf32>
    %cst_64 = arith.constant 4.000000e+00 : f32
    %104 = vector.broadcast %cst_64 : f32 to vector<1x32xf32>
    %105 = arith.divf %103, %104 : vector<1x32xf32>
    %106 = vector.extract_strided_slice %51 {offsets = [0, 0], sizes = [4, 32], strides = [1, 1]} : vector<8x32xf32> to vector<4x32xf32>
    %cst_65 = arith.constant dense<0.000000e+00> : vector<32xf32>
    %107 = vector.multi_reduction <add>, %106, %cst_65 [0] : vector<4x32xf32> to vector<32xf32>
    %108 = vector.shape_cast %107 : vector<32xf32> to vector<1x32xf32>
    %cst_66 = arith.constant 4.000000e+00 : f32
    %109 = vector.broadcast %cst_66 : f32 to vector<1x32xf32>
    %110 = arith.divf %108, %109 : vector<1x32xf32>
    %111 = tpu.concatenate %105, %110 in 0 : vector<1x32xf32>, vector<1x32xf32> -> vector<2x32xf32>
    %112 = vector.extract_strided_slice %29 {offsets = [3, 0], sizes = [1, 32], strides = [1, 1]} : vector<8x32xf32> to vector<1x32xf32>
    %113 = vector.extract_strided_slice %51 {offsets = [3, 0], sizes = [1, 32], strides = [1, 1]} : vector<8x32xf32> to vector<1x32xf32>
    %114 = tpu.concatenate %112, %113 in 0 : vector<1x32xf32>, vector<1x32xf32> -> vector<2x32xf32>
    %115 = vector.extract_strided_slice %40 {offsets = [0, 0], sizes = [7, 32], strides = [1, 1]} : vector<8x32xf32> to vector<7x32xf32>
    %cst_67 = arith.constant dense<0.000000e+00> : vector<32xf32>
    %116 = vector.multi_reduction <add>, %115, %cst_67 [0] : vector<7x32xf32> to vector<32xf32>
    %117 = vector.shape_cast %116 : vector<32xf32> to vector<1x32xf32>
    %cst_68 = arith.constant 7.000000e+00 : f32
    %118 = vector.broadcast %cst_68 : f32 to vector<1x32xf32>
    %119 = arith.divf %117, %118 : vector<1x32xf32>
    %120 = vector.extract_strided_slice %62 {offsets = [0, 0], sizes = [7, 32], strides = [1, 1]} : vector<8x32xf32> to vector<7x32xf32>
    %cst_69 = arith.constant dense<0.000000e+00> : vector<32xf32>
    %121 = vector.multi_reduction <add>, %120, %cst_69 [0] : vector<7x32xf32> to vector<32xf32>
    %122 = vector.shape_cast %121 : vector<32xf32> to vector<1x32xf32>
    %cst_70 = arith.constant 7.000000e+00 : f32
    %123 = vector.broadcast %cst_70 : f32 to vector<1x32xf32>
    %124 = arith.divf %122, %123 : vector<1x32xf32>
    %125 = tpu.concatenate %119, %124 in 0 : vector<1x32xf32>, vector<1x32xf32> -> vector<2x32xf32>
    %126 = vector.extract_strided_slice %40 {offsets = [7, 0], sizes = [1, 32], strides = [1, 1]} : vector<8x32xf32> to vector<1x32xf32>
    %127 = vector.extract_strided_slice %62 {offsets = [7, 0], sizes = [1, 32], strides = [1, 1]} : vector<8x32xf32> to vector<1x32xf32>
    %128 = tpu.concatenate %126, %127 in 0 : vector<1x32xf32>, vector<1x32xf32> -> vector<2x32xf32>
    %129 = vector.extract_strided_slice %29 {offsets = [6, 0], sizes = [1, 32], strides = [1, 1]} : vector<8x32xf32> to vector<1x32xf32>
    %130 = vector.extract_strided_slice %51 {offsets = [6, 0], sizes = [1, 32], strides = [1, 1]} : vector<8x32xf32> to vector<1x32xf32>
    %131 = tpu.concatenate %129, %130 in 0 : vector<1x32xf32>, vector<1x32xf32> -> vector<2x32xf32>
    %132 = vector.extract_strided_slice %29 {offsets = [7, 0], sizes = [1, 32], strides = [1, 1]} : vector<8x32xf32> to vector<1x32xf32>
    %133 = vector.extract_strided_slice %51 {offsets = [7, 0], sizes = [1, 32], strides = [1, 1]} : vector<8x32xf32> to vector<1x32xf32>
    %134 = tpu.concatenate %132, %133 in 0 : vector<1x32xf32>, vector<1x32xf32> -> vector<2x32xf32>
    %cst_71 = arith.constant 1.000000e-01 : f32
    %135 = vector.broadcast %cst_71 : f32 to vector<2x32xf32>
    %136 = arith.mulf %135, %111 : vector<2x32xf32>
    %cst_72 = arith.constant 0.899999976 : f32
    %137 = vector.broadcast %cst_72 : f32 to vector<2x32xf32>
    %138 = arith.mulf %137, %114 : vector<2x32xf32>
    %139 = arith.addf %136, %138 : vector<2x32xf32>
    %cst_73 = arith.constant dense<0.000000e+00> : vector<2x32xf32>
    %140 = tpu.matmul %128, %7, %cst_73 {dimension_numbers = #tpu.dot_dimension_numbers<[1], [0], [0], [1], [0, 0, 1, 1], [], []>, precision = #tpu.contract_precision<fp32>} : vector<2x32xf32>, vector<32x32xf32>, vector<2x32xf32> -> vector<2x32xf32>
    %141 = arith.mulf %140, %125 : vector<2x32xf32>
    %cst_74 = arith.constant dense<0.000000e+00> : vector<2xf32>
    %142 = vector.multi_reduction <add>, %141, %cst_74 [1] : vector<2x32xf32> to vector<2xf32>
    %143 = vector.shape_cast %142 : vector<2xf32> to vector<2x1xf32>
    %144 = vector.broadcast %12 : f32 to vector<2x1xf32>
    %145 = arith.addf %143, %144 : vector<2x1xf32>
    %146 = vector.extract_strided_slice %125 {offsets = [0, 0], sizes = [1, 32], strides = [1, 1]} : vector<2x32xf32> to vector<1x32xf32>
    %147 = vector.extract_strided_slice %125 {offsets = [0, 0], sizes = [1, 32], strides = [1, 1]} : vector<2x32xf32> to vector<1x32xf32>
    %148 = tpu.concatenate %146, %147 in 0 : vector<1x32xf32>, vector<1x32xf32> -> vector<2x32xf32>
    %149 = arith.mulf %140, %148 : vector<2x32xf32>
    %cst_75 = arith.constant dense<0.000000e+00> : vector<2xf32>
    %150 = vector.multi_reduction <add>, %149, %cst_75 [1] : vector<2x32xf32> to vector<2xf32>
    %151 = vector.shape_cast %150 : vector<2xf32> to vector<2x1xf32>
    %152 = vector.broadcast %12 : f32 to vector<2x1xf32>
    %153 = arith.addf %151, %152 : vector<2x1xf32>
    %154 = vector.extract_strided_slice %148 {offsets = [0, 0], sizes = [1, 32], strides = [1, 1]} : vector<2x32xf32> to vector<1x32xf32>
    %155 = vector.extract_strided_slice %148 {offsets = [0, 0], sizes = [1, 32], strides = [1, 1]} : vector<2x32xf32> to vector<1x32xf32>
    %156 = tpu.concatenate %154, %155 in 0 : vector<1x32xf32>, vector<1x32xf32> -> vector<2x32xf32>
    %157 = arith.mulf %140, %156 : vector<2x32xf32>
    %cst_76 = arith.constant dense<0.000000e+00> : vector<2xf32>
    %158 = vector.multi_reduction <add>, %157, %cst_76 [1] : vector<2x32xf32> to vector<2xf32>
    %159 = vector.shape_cast %158 : vector<2xf32> to vector<2x1xf32>
    %160 = vector.broadcast %12 : f32 to vector<2x1xf32>
    %161 = arith.addf %159, %160 : vector<2x1xf32>
    %162 = tpu.concatenate %145, %153, %161 in 0 : vector<2x1xf32>, vector<2x1xf32>, vector<2x1xf32> -> vector<6x1xf32>
    %c0_77 = arith.constant 0 : index
    %c0_78 = arith.constant 0 : index
    %163 = vector.load %arg16[%c0_77, %c0_78] : memref<6x1xf32, #tpu.memory_space<vmem>>, vector<6x1xf32>
    tpu.vector_store %arg16[%c0_77, %c0_78], %162 {strides = array<i32>} : memref<6x1xf32, #tpu.memory_space<vmem>>, vector<6x1xf32>,
    %164 = tpu.concatenate %131, %134 in 0 : vector<2x32xf32>, vector<2x32xf32> -> vector<4x32xf32>
    %cst_79 = arith.constant dense<0.000000e+00> : vector<4x32xf32>
    %165 = tpu.matmul %164, %6, %cst_79 {dimension_numbers = #tpu.dot_dimension_numbers<[1], [0], [0], [1], [0, 0, 1, 1], [], []>, precision = #tpu.contract_precision<fp32>} : vector<4x32xf32>, vector<32x32xf32>, vector<4x32xf32> -> vector<4x32xf32>
    %166 = vector.extract_strided_slice %165 {offsets = [0, 0], sizes = [2, 32], strides = [1, 1]} : vector<4x32xf32> to vector<2x32xf32>
    %167 = vector.extract_strided_slice %165 {offsets = [2, 0], sizes = [2, 32], strides = [1, 1]} : vector<4x32xf32> to vector<2x32xf32>
    %168 = arith.mulf %166, %139 : vector<2x32xf32>
    %cst_80 = arith.constant dense<0.000000e+00> : vector<2xf32>
    %169 = vector.multi_reduction <add>, %168, %cst_80 [1] : vector<2x32xf32> to vector<2xf32>
    %170 = vector.shape_cast %169 : vector<2xf32> to vector<2x1xf32>
    %171 = vector.broadcast %11 : f32 to vector<2x1xf32>
    %172 = arith.addf %170, %171 : vector<2x1xf32>
    %173 = arith.mulf %167, %139 : vector<2x32xf32>
    %cst_81 = arith.constant dense<0.000000e+00> : vector<2xf32>
    %174 = vector.multi_reduction <add>, %173, %cst_81 [1] : vector<2x32xf32> to vector<2xf32>
    %175 = vector.shape_cast %174 : vector<2xf32> to vector<2x1xf32>
    %176 = vector.broadcast %11 : f32 to vector<2x1xf32>
    %177 = arith.addf %175, %176 : vector<2x1xf32>
    %178 = tpu.concatenate %172, %177, %177 in 0 : vector<2x1xf32>, vector<2x1xf32>, vector<2x1xf32> -> vector<6x1xf32>
    %c0_82 = arith.constant 0 : index
    %c0_83 = arith.constant 0 : index
    %179 = vector.load %arg15[%c0_82, %c0_83] : memref<6x1xf32, #tpu.memory_space<vmem>>, vector<6x1xf32>
    tpu.vector_store %arg15[%c0_82, %c0_83], %178 {strides = array<i32>} : memref<6x1xf32, #tpu.memory_space<vmem>>, vector<6x1xf32>,
    return
  }
}

</mosaic_0001>

<bundles_post_ra>
// kernel: model_forward.1
= control target key start
LH: loop header
LB: loop body
LE: loop exit
PB: predicated region body
PF: predicated region fallthrough
CT: control target
= control target key end

     0   :  { %s3353_s0 = inlined_call_operand.vmem [shape: f32[2,8,16], index: 0, kind: input, shape index: {}]   ;;  %s3354_s1 = inlined_call_operand.hbm [shape: f32[2,8,8], index: 1, kind: input, shape index: {}]   ;;  %s3355_s2 = inlined_call_operand.hbm [shape: f32[2,8,16], index: 2, kind: input, shape index: {}]   ;;  %s3356_s3 = inlined_call_operand.hbm [shape: f32[2,8,8], index: 3, kind: input, shape index: {}]   ;;  %s3357_s4 = inlined_call_operand.hbm [shape: f32[16,32], index: 4, kind: input, shape index: {}]   ;;  %s3358_s5 = inlined_call_operand.vmem [shape: f32[1,32], index: 5, kind: input, shape index: {}]   ;;  %s3359_s6 = inlined_call_operand.hbm [shape: f32[16,32], index: 6, kind: input, shape index: {}]   ;;  %s3360_s7 = inlined_call_operand.vmem [shape: f32[1,32], index: 7, kind: input, shape index: {}]   ;;  %s3361_s8 = inlined_call_operand.hbm [shape: f32[32,32], index: 8, kind: input, shape index: {}]   ;;  %s3362_s9 = inlined_call_operand.vmem [shape: f32[1,32], index: 9, kind: input, shape index: {}]   ;;  %s3363_s10 = inlined_call_operand.hbm [shape: f32[32,32], index: 10, kind: input, shape index: {}]   ;;  %s3364_s11 = inlined_call_operand.hbm [shape: f32[32,32], index: 11, kind: input, shape index: {}]   ;;  %s3365_s12 = inlined_call_operand.vmem [shape: f32[3], index: 12, kind: input, shape index: {}]   ;;  %s3366_s13 = inlined_call_operand.vmem [shape: f32[2], index: 13, kind: input, shape index: {}]   ;;  %s3367_s14 = inlined_call_operand.hbm [shape: f32[2,4,4], index: 14, kind: output, shape index: {0}]   ;;  %s3368_s15 = inlined_call_operand.vmem [shape: f32[6,1], index: 15, kind: output, shape index: {1}]   ;;  %s3369_s16 = inlined_call_operand.vmem [shape: f32[6,1], index: 16, kind: output, shape index: {2}]  }
   0x1   :  { %3371 = sst [smem:[#allocation29_spill]] %s3353_s0 }
   0x2   :  { %22 = vsyncpa [#allocation3], 0 }
   0x3   :  { %23 = vsyncpa [#allocation7], 0 }
   0x4   :  { %24 = vsyncpa [#allocation10], 0 }
   0x5   :  { %25 = vsyncpa [#allocation13], 0 }
   0x6   :  { %26 = vsyncpa [#allocation16], 0 }
   0x7   :  { %27 = vsyncpa [#allocation5], 0 }
   0x8   :  { %28 = vsyncpa [#allocation19], 0 }
   0x9   :  { %29 = vsyncpa [#allocation4], 0  ;;  %s49_s23 = sshll.u32 %s3355_s2, 4  ;;  %s2885_s24 = smov [#allocation6]   ;;  %s50_s23 = int_to_ptr.hbm [resolvable:$true] %s49_s23 }
   0xa   :  { %s51_s25 = sshll.u32 %s2885_s24, 4  ;;  %s75_s28 = sshll.u32 %s3357_s4, 4  ;;  %s52_s25 = int_to_ptr.vmem [resolvable:$true] %s51_s25  ;;  %s76_s28 = int_to_ptr.hbm [resolvable:$true] %s75_s28 }
   0xb   :  { %s2886_s29 = smov 128   ;;  %s2887_s30 = smov 8  }
   0xc   :  { %57 = dma.hbm_to_vmem [thread:$0]  %s50_s23, 256, %s52_s25, [#allocation7], %s2886_s29, %s2886_s29, %s2887_s30  }
   0xd   :  { %s2888_s0 = smov [#allocation9]   ;;  %s105_s2 = sshll.u32 %s3361_s8, 4  ;;  %s106_s2 = int_to_ptr.hbm [resolvable:$true] %s105_s2 }
   0xe   :  { %s77_s17 = sshll.u32 %s2888_s0, 4  ;;  %s36_s21 = sshll.u32 %s3354_s1, 4  ;;  %s78_s17 = int_to_ptr.vmem [resolvable:$true] %s77_s17  ;;  %s37_s21 = int_to_ptr.hbm [resolvable:$true] %s36_s21 }
   0xf   :  { %83 = dma.hbm_to_vmem [thread:$0]  %s76_s28, 256, %s78_s17, [#allocation10], %s2886_s29, %s2886_s29, %s2887_s30  }
  0x10   :  { %s2889_s22 = smov [#allocation12]   ;;  %s2890_s23 = smov [#allocation2]  }
  0x11   :  { %s107_s24 = sshll.u32 %s2889_s22, 4  ;;  %s38_s8 = sshll.u32 %s2890_s23, 4  ;;  %s108_s24 = int_to_ptr.vmem [resolvable:$true] %s107_s24  ;;  %s39_s8 = int_to_ptr.vmem [resolvable:$true] %s38_s8 }
  0x12   :  { %113 = dma.hbm_to_vmem [thread:$0]  %s106_s2, 512, %s108_s24, [#allocation13], %s2886_s29, %s2886_s29, %s2887_s30  }
  0x13   :  { %s62_s27 = sshll.u32 %s3356_s3, 4  ;;  %s90_s0 = sshll.u32 %s3359_s6, 4  ;;  %s63_s27 = int_to_ptr.hbm [resolvable:$true] %s62_s27  ;;  %s91_s0 = int_to_ptr.hbm [resolvable:$true] %s90_s0 }
  0x14   :  { %44 = dma.hbm_to_vmem [thread:$0]  %s37_s21, 256, %s39_s8, [#allocation3], %s2886_s29, %s2886_s29, %s2887_s30  }
  0x15   :  { %s2891_s17 = smov [#allocation8]   ;;  %s2892_s19 = smov [#allocation11]  }
  0x16   :  { %s64_s18 = sshll.u32 %s2891_s17, 4  ;;  %s92_s3 = sshll.u32 %s2892_s19, 4  ;;  %s65_s18 = int_to_ptr.vmem [resolvable:$true] %s64_s18  ;;  %s93_s3 = int_to_ptr.vmem [resolvable:$true] %s92_s3 }
  0x17   :  { %70 = dma.hbm_to_vmem [thread:$0]  %s63_s27, 256, %s65_s18, [#allocation7], %s2886_s29, %s2886_s29, %s2887_s30  }
  0x18   :  { %s120_s20 = sshll.u32 %s3363_s10, 4  ;;  %s133_s22 = sshll.u32 %s3364_s11, 4  ;;  %s121_s20 = int_to_ptr.hbm [resolvable:$true] %s120_s20  ;;  %s134_s22 = int_to_ptr.hbm [resolvable:$true] %s133_s22 }
  0x19   :  { %98 = dma.hbm_to_vmem [thread:$0]  %s91_s0, 256, %s93_s3, [#allocation10], %s2886_s29, %s2886_s29, %s2887_s30  }
  0x1a   :  { %s2893_s24 = smov [#allocation14]   ;;  %s2894_s8 = smov [#allocation15]  }
  0x1b   :  { %s122_s23 = sshll.u32 %s2893_s24, 4  ;;  %s135_s10 = sshll.u32 %s2894_s8, 4  ;;  %s123_s23 = int_to_ptr.vmem [resolvable:$true] %s122_s23  ;;  %s136_s10 = int_to_ptr.vmem [resolvable:$true] %s135_s10 }
  0x1c   :  { %128 = dma.hbm_to_vmem [thread:$0]  %s121_s20, 512, %s123_s23, [#allocation13], %s2886_s29, %s2886_s29, %s2887_s30  }
  0x1d   :  { %s147_s27 = sshll.u32 %s3365_s12, 4  ;;  %s156_s28 = sshll.u32 %s3366_s13, 4  ;;  %s148_s27 = int_to_ptr.vmem [resolvable:$true] %s147_s27  ;;  %s157_s28 = int_to_ptr.vmem [resolvable:$true] %s156_s28 }
  0x1e   :  { %141 = dma.hbm_to_vmem [thread:$0]  %s134_s22, 512, %s136_s10, [#allocation16], %s2886_s29, %s2886_s29, %s2887_s30  }
  0x1f   :  { %s2895_s0 = smov [#allocation17]   ;;  %s2896_s17 = smov [#allocation18]  }
  0x20   :  { %150 = dma.vmem_to_smem %s148_s27, 16, %s2895_s0, [#allocation5]  }
  0x21   :  { %159 = dma.vmem_to_smem %s157_s28, 16, %s2896_s17, [#allocation19]  }
  0x22   :  { %2869 = dma.done.wait [#allocation3], 256  }
  0x23   :  { %2870 = vsyncadd [#allocation3], 4294967040 }
  0x24   :  { %2871 = dma.done.wait [#allocation7], 512  }
  0x25   :  { %2872 = vsyncadd [#allocation7], 4294966784 }
  0x26   :  { %2873 = dma.done.wait [#allocation10], 512  }
  0x27   :  { %2874 = vsyncadd [#allocation10], 4294966784 }
  0x28   :  { %2875 = dma.done.wait [#allocation13], 1024  }
  0x29   :  { %2876 = vsyncadd [#allocation13], 4294966272 }
  0x2a   :  { %2877 = dma.done.wait [#allocation16], 512  }
  0x2b   :  { %2878 = vsyncadd [#allocation16], 4294966784 }
  0x2c   :  { %2879 = dma.done.wait [#allocation5], 16  }
  0x2d   :  { %2880 = vsyncadd [#allocation5], 4294967280 }
  0x2e   :  { %2881 = dma.done.wait [#allocation19], 16  }
  0x2f   :  { %2882 = vsyncadd [#allocation19], 4294967280 }
  0x30   :  { %200 = sfence }
  0x31   :  { %v202_v0 = vld [vmem:[#allocation9 + $0x8] sm:$0xff]  ;;  %v201_v1 = vld [vmem:[#allocation9] sm:$0xff]  ;;  %s3372_s29 = sld [smem:[#allocation29_spill]]  ;;  %vm227_vm0 = vcmask 130048   ;;  %v205_v6 = vld [vmem:[#allocation11 + $0x8] sm:$0xff]  ;;  %vm626_vm1 = vcmask 64512  }
  0x32   :  { %v248_v3 = vand.u32 4294901760, %v202_v0  ;;  %v3044_v4 = vand.u32 4294901760, %v201_v1  ;;  %v204_v8 = vld [vmem:[#allocation11] sm:$0xff]  ;;  %v446_v10 = vand.u32 4294901760, %v205_v6  ;;  %v424_v13 = vld [vmem:[#allocation6] sm:$0xff]  ;;  %v425_v28 = vld [vmem:[#allocation6 + $0x8] sm:$0xff] }
  0x33   :  { %v3053_v12 = vand.u32 4294901760, %v204_v8  ;;  %v427_v17 = vsel %vm227_vm0, %v424_v13, 0  ;;  %v430_v38 = vsel %vm227_vm0, %v425_v28, 0  ;;  %v3081_v52 = vld [vmem:[#allocation2] sm:$0xff]  ;;  %vm2055_vm3 = vcmask 257024   ;;  %s3211_s21 = sld [smem:[#allocation17 + $0x2]] }
  0x34   :  { %v284_v14 = vsub.f32 %v202_v0, %v248_v3  ;;  %350 = vmatpush.msra.mxu3 %v248_v3  ;;  %249 = vmatpush.msra.mxu0 %v248_v3  ;;  %v290_v15 = vsub.f32 %v201_v1, %v3044_v4  ;;  %v482_v19 = vsub.f32 %v205_v6, %v446_v10  ;;  %v3061_v21 = vand.u32 4294901760, %v427_v17  ;;  %s2575_s8 = sshll.u32 %s3367_s14, 4  ;;  %s2900_s10 = smov 64   ;;  %s2576_s8 = int_to_ptr.hbm [resolvable:$true] %s2575_s8 }
  0x35   :  { %v488_v20 = vsub.f32 %v204_v8, %v3053_v12  ;;  %v458_v44 = vand.u32 4294901760, %v430_v38  ;;  %v628_v54 = vsel %vm626_vm1, %v3081_v52, 0  ;;  %vm2087_vm5 = vcmask 260096   ;;  %s2901_s25 = smov 4   ;;  %s223_s26 = sld [smem:[#allocation18]] }
  0x36   :  { %320 = vmatpush.msra.mxu2 %v284_v14  ;;  %352 = vmatpush.msra.mxu3 %v3044_v4  ;;  %v285_v22 = vand.u32 4294901760, %v284_v14  ;;  %v291_v23 = vand.u32 4294901760, %v290_v15  ;;  %v483_v26 = vand.u32 4294901760, %v482_v19  ;;  %v451_v31 = vsub.f32 %v427_v17, %v3061_v21  ;;  %s2604_s27 = sld [smem:[#allocation18 + $0x1]] }
  0x37   :  { %v225_v2 = vld [vmem:[%s3372_s29] sm:$0xff]  ;;  %v226_v7 = vld [vmem:[%s3372_s29 + $0x8] sm:$0xff]  ;;  %251 = vmatpush.msra.mxu0 %v3044_v4  ;;  %v489_v27 = vand.u32 4294901760, %v488_v20  ;;  %v459_v47 = vsub.f32 %v430_v38, %v458_v44  ;;  %v3085_v58 = vand.u32 4294901760, %v628_v54  ;;  %vm2079_vm7 = vcmask 1040384  }
  0x38   :  { %v229_v5 = vsel %vm227_vm0, %v225_v2, 0  ;;  %v232_v11 = vsel %vm227_vm0, %v226_v7, 0  ;;  %323 = vmatpush.msra.mxu2 %v290_v15  ;;  %v286_v29 = vsub.f32 %v284_v14, %v285_v22  ;;  %v292_v30 = vsub.f32 %v290_v15, %v291_v23 }
  0x39   :  { %v3050_v9 = vand.u32 4294901760, %v229_v5  ;;  %v3056_v16 = vand.u32 4294901760, %v232_v11  ;;  %383 = vmatpush.msrb.mxu0 %v285_v22  ;;  %v484_v34 = vsub.f32 %v482_v19, %v483_v26  ;;  %v490_v35 = vsub.f32 %v488_v20, %v489_v27 }
  0x3a   :  { %v287_v36 = vand.u32 4294901760, %v286_v29  ;;  %v293_v37 = vand.u32 4294901760, %v292_v30  ;;  %447 = vmatpush.msrb.mxu2 %v446_v10  ;;  %v452_v43 = vand.u32 4294901760, %v451_v31  ;;  %v460_v49 = vand.u32 4294901760, %v459_v47  ;;  %v3092_v29 = vld [vmem:[#allocation2 + $0x8] sm:$0xff] }
  0x3b   :  { %v253_v18 = vsub.f32 %v229_v5, %v3050_v9  ;;  %v261_v24 = vsub.f32 %v232_v11, %v3056_v16  ;;  %387 = vmatpush.msrb.mxu0 %v291_v23  ;;  %v485_v40 = vand.u32 4294901760, %v484_v34  ;;  %v491_v41 = vand.u32 4294901760, %v490_v35 }
  0x3c   :  { %288 = vmatpush.msra.mxu1 %v287_v36  ;;  %449 = vmatpush.msrb.mxu2 %v3053_v12  ;;  %v453_v46 = vsub.f32 %v451_v31, %v452_v43  ;;  %v461_v50 = vsub.f32 %v459_v47, %v460_v49  ;;  %v648_v61 = vsub.f32 %v628_v54, %v3085_v58  ;;  %v940_v34 = vsel %vm626_vm1, %v3092_v29, 0 }
  0x3d   :  { %v254_v25 = vand.u32 4294901760, %v253_v18  ;;  %326 = vmatmul.f32.vlgmr.msra.gmra.mxu2 %v253_v18  ;;  %v262_v33 = vand.u32 4294901760, %v261_v24  ;;  %486 = vmatpush.msrb.mxu3 %v485_v40  ;;  %vm1248_vm8 = vcmask 1043456   ;;  %vm1250_vm9 = vcmask 261120  }
  0x3e   :  { %294 = vmatpush.msra.mxu1 %v293_v37  ;;  %581 = vmatpush.msra.mxu2 %v483_v26  ;;  %v454_v48 = vand.u32 4294901760, %v453_v46  ;;  %v462_v51 = vand.u32 4294901760, %v461_v50  ;;  %v649_v2 = vand.u32 4294901760, %v648_v61  ;;  %vm2351_vm10 = vcmask 1041408  }
  0x3f   :  { %356 = vmatmul.f32.vlgmr.msra.gmra.mxu3 %v254_v25  ;;  %v255_v32 = vsub.f32 %v253_v18, %v254_v25  ;;  %v263_v42 = vsub.f32 %v261_v24, %v262_v33  ;;  %296 = vmatmul.f32.vlgmr.msra.gmra.mxu1 %v3050_v9  ;;  %vm1442_vm14 = vcmask 31744   ;;  %vm2052_vm0 = vcmask 27648  }
  0x40   :  { %492 = vmatpush.msrb.mxu3 %v491_v41  ;;  %412 = vmatpush.msrb.mxu1 %v248_v3  ;;  %v650_v6 = vsub.f32 %v648_v61, %v649_v2  ;;  %v3101_v41 = vand.u32 4294901760, %v940_v34 }
  0x41   :  { %v256_v39 = vand.u32 4294901760, %v255_v32  ;;  %v264_v45 = vand.u32 4294901760, %v263_v42  ;;  %585 = vmatpush.msra.mxu2 %v489_v27 }
  0x42   :  { %414 = vmatpush.msrb.mxu1 %v3044_v4  ;;  %610 = vmatpush.msra.mxu3 %v446_v10  ;;  %v651_v14 = vand.u32 4294901760, %v650_v6 }
  0x43   :  { %257 = vmatmul.f32.vlgmr.msra.gmra.mxu0 %v256_v39 }
  0x44   :  { %518 = vmatpush.msra.mxu0 %v482_v19  ;;  %548 = vmatpush.msra.mxu1 %v446_v10  ;;  %v780_v10 = vld [vmem:[#allocation8] sm:$0xff] }
  0x45   :  { %331 = vmatmul.f32.gmra.mxu2 %v261_v24  ;;  %612 = vmatpush.msra.mxu3 %v3053_v12 }
  0x46   :  { %521 = vmatpush.msra.mxu0 %v488_v20  ;;  %550 = vmatpush.msra.mxu1 %v3053_v12 }
  0x47   :  { %362 = vmatmul.f32.gmra.mxu3 %v262_v33  ;;  %300 = vmatmul.f32.gmra.mxu1 %v3056_v16 }
  0x4b   :  { %265 = vmatmul.f32.gmra.mxu0 %v264_v45 }
  0x4d   :  { %455 = vmatmul.f32.vlgmr.msrb.gmra.mxu2 %v454_v48 }
  0x4f   :  { %494 = vmatmul.f32.vlgmr.msrb.gmra.mxu3 %v3061_v21  ;;  %416 = vmatmul.f32.vlgmr.msrb.gmra.mxu1 %v3050_v9 }
  0x53   :  { %389 = vmatmul.f32.vlgmr.msrb.gmra.mxu0 %v3050_v9 }
  0x55   :  { %463 = vmatmul.f32.gmra.mxu2 %v462_v51 }
  0x57   :  { %498 = vmatmul.f32.gmra.mxu3 %v458_v44  ;;  %420 = vmatmul.f32.gmra.mxu1 %v3056_v16 }
  0x5b   :  { %393 = vmatmul.f32.gmra.mxu0 %v3056_v16  ;;  %v785_v16 = vsel %vm626_vm1, %v780_v10, 0 }
  0x5c   :  { %v3089_v20 = vand.u32 4294901760, %v785_v16 }
  0x5d   :  { %587 = vmatmul.f32.vlgmr.msra.gmra.mxu2 %v3061_v21 }
  0x5e   :  { %v805_v28 = vsub.f32 %v785_v16, %v3089_v20 }
  0x5f   :  { %614 = vmatmul.f32.vlgmr.msra.gmra.mxu3 %v3061_v21  ;;  %554 = vmatmul.f32.vlgmr.msra.gmra.mxu1 %v452_v43 }
  0x60   :  { %v806_v36 = vand.u32 4294901760, %v805_v28 }
  0x63   :  { %524 = vmatmul.f32.vlgmr.msra.gmra.mxu0 %v451_v31 }
  0x65   :  { %591 = vmatmul.f32.gmra.mxu2 %v458_v44 }
  0x67   :  { %618 = vmatmul.f32.gmra.mxu3 %v458_v44  ;;  %560 = vmatmul.f32.gmra.mxu1 %v460_v49  ;;  %v807_v44 = vsub.f32 %v805_v28, %v806_v36 }
  0x69   :  { %v808_v51 = vand.u32 4294901760, %v807_v44 }
  0x6b   :  { %529 = vmatmul.f32.gmra.mxu0 %v459_v47  ;;  %v960_v47 = vsub.f32 %v940_v34, %v3101_v41 }
  0xbc   :  { %v297_v55 = vpop.f32.mrf.mxu1 }
  0xc0   :  { %v258_v53 = vpop.f32.mrf.mxu0  ;;  %v327_v56 = vpop.f32.mrf.mxu2 }
  0xc1   :  { %v298_v59 = vadd.f32 %v297_v55, %v258_v53 }
  0xc2   :  { %v357_v57 = vpop.f32.mrf.mxu3 }
  0xc3   :  { %v328_v0 = vadd.f32 %v327_v56, %v298_v59  ;;  %v961_v59 = vand.u32 4294901760, %v960_v47 }
  0xc4   :  { %v301_v62 = vpop.f32.mrf.mxu1 }
  0xc5   :  { %v358_v3 = vadd.f32 %v357_v57, %v328_v0 }
  0xc8   :  { %v266_v60 = vpop.f32.mrf.mxu0  ;;  %v332_v63 = vpop.f32.mrf.mxu2 }
  0xc9   :  { %v302_v4 = vadd.f32 %v301_v62, %v266_v60  ;;  %v1092_v60 = vld [vmem:[#allocation8 + $0x8] sm:$0xff] }
  0xca   :  { %v363_v1 = vpop.f32.mrf.mxu3 }
  0xcb   :  { %v333_v11 = vadd.f32 %v332_v63, %v302_v4 }
  0xcc   :  { %v417_v8 = vpop.f32.mrf.mxu1 }
  0xcd   :  { %v364_v17 = vadd.f32 %v363_v1, %v333_v11 }
  0xd0   :  { %v390_v5 = vpop.f32.mrf.mxu0  ;;  %v456_v9 = vpop.f32.mrf.mxu2 }
  0xd1   :  { %v391_v7 = vadd.f32 %v390_v5, %v358_v3 }
  0xd2   :  { %v495_v13 = vpop.f32.mrf.mxu3 }
  0xd3   :  { %v418_v12 = vadd.f32 %v417_v8, %v391_v7  ;;  %v496_v32 = vadd.f32 %v495_v13, %v456_v9 }
  0xd4   :  { %v421_v23 = vpop.f32.mrf.mxu1 }
  0xd5   :  { %v645_v15 = vand.u32 4294901760, %v418_v12 }
  0xd7   :  { %v672_v18 = vsub.f32 %v418_v12, %v645_v15  ;;  %646 = vmatpush.msrb.mxu0 %v645_v15  ;;  %722 = vmatpush.msrb.mxu3 %v645_v15 }
  0xd8   :  { %v394_v19 = vpop.f32.mrf.mxu0  ;;  %652 = vmatmul.f32.vlgmr.msrb.gmra.mxu0 %v651_v14  ;;  %726 = vmatmul.f32.vlgmr.msrb.gmra.mxu3 %v649_v2  ;;  %v464_v24 = vpop.f32.mrf.mxu2  ;;  %v962_v2 = vsub.f32 %v960_v47, %v961_v59 }
  0xd9   :  { %v673_v21 = vand.u32 4294901760, %v672_v18  ;;  %v395_v22 = vadd.f32 %v394_v19, %v364_v17  ;;  %699 = vmatpush.msrb.mxu2 %v672_v18  ;;  %v3118_v17 = vld [vmem:[%s3358_s5] ss:$0 sm:$0xff]  ;;  %s3126_s5 = sld [smem:[#allocation17]] }
  0xda   :  { %702 = vmatmul.f32.vlgmr.msrb.gmra.mxu2 %v648_v61  ;;  %v499_v27 = vpop.f32.mrf.mxu3  ;;  %v963_v8 = vand.u32 4294901760, %v962_v2 }
  0xdb   :  { %v674_v25 = vsub.f32 %v672_v18, %v673_v21  ;;  %v422_v26 = vadd.f32 %v421_v23, %v395_v22  ;;  %748 = vmatpush.msra.mxu0 %v673_v21  ;;  %v500_v48 = vadd.f32 %v499_v27, %v464_v24  ;;  %v210_v23 = vld [vmem:[#allocation12 + $0x18] sm:$0xff] }
  0xdc   :  { %v555_v39 = vpop.f32.mrf.mxu1 }
  0xdd   :  { %v3094_v30 = vand.u32 4294901760, %v422_v26  ;;  %v675_v31 = vand.u32 4294901760, %v674_v25  ;;  %v3121_v25 = vand.u32 4294901760, %v210_v23 }
  0xdf   :  { %v984_v33 = vsub.f32 %v422_v26, %v3094_v30  ;;  %676 = vmatpush.msrb.mxu1 %v675_v31  ;;  %v209_v26 = vld [vmem:[#allocation12 + $0x10] sm:$0xff] }
  0xe0   :  { %v525_v35 = vpop.f32.mrf.mxu0  ;;  %678 = vmatmul.f32.vlgmr.msrb.gmra.mxu1 %v3085_v58  ;;  %750 = vmatmul.f32.vlgmr.msra.gmra.mxu0 %v3085_v58  ;;  %v588_v40 = vpop.f32.mrf.mxu2 }
  0xe1   :  { %v526_v37 = vadd.f32 %v525_v35, %v496_v32  ;;  %770 = vmatpush.msra.mxu1 %v645_v15  ;;  %v985_v38 = vand.u32 4294901760, %v984_v33  ;;  %v208_v32 = vld [vmem:[#allocation12 + $0x8] sm:$0xff] }
  0xe2   :  { %v615_v43 = vpop.f32.mrf.mxu3 }
  0xe3   :  { %v556_v42 = vadd.f32 %v555_v39, %v526_v37  ;;  %v986_v46 = vsub.f32 %v984_v33, %v985_v38  ;;  %v207_v37 = vld [vmem:[#allocation12] sm:$0xff] }
  0xe4   :  { %v561_v55 = vpop.f32.mrf.mxu1  ;;  %v1272_v39 = vand.u32 4294901760, %v207_v37 }
  0xe5   :  { %v589_v45 = vadd.f32 %v588_v40, %v556_v42  ;;  %v987_v57 = vand.u32 4294901760, %v986_v46  ;;  %v3131_v46 = vld [vmem:[%s3360_s7] ss:$0 sm:$0xff]  ;;  %s3139_s7 = sld [smem:[#allocation17 + $0x1]] }
  0xe7   :  { %v616_v49 = vadd.f32 %v615_v43, %v589_v45  ;;  %v1314_v45 = vsub.f32 %v207_v37, %v1272_v39 }
  0xe8   :  { %v530_v50 = vpop.f32.mrf.mxu0  ;;  %772 = vmatmul.f32.vlgmr.msra.gmra.mxu1 %v3085_v58  ;;  %v592_v56 = vpop.f32.mrf.mxu2  ;;  %v1094_v58 = vsel %vm626_vm1, %v1092_v60, 0 }
  0xe9   :  { %v802_v53 = vand.u32 4294901760, %v616_v49  ;;  %v531_v54 = vadd.f32 %v530_v50, %v500_v48  ;;  %v1113_v5 = vand.u32 4294901760, %v1094_v58 }
  0xea   :  { %v619_v63 = vpop.f32.mrf.mxu3 }
  0xeb   :  { %v829_v61 = vsub.f32 %v616_v49, %v802_v53  ;;  %v562_v62 = vadd.f32 %v561_v55, %v531_v54  ;;  %803 = vmatpush.msra.mxu2 %v802_v53  ;;  %879 = vmatpush.msrb.mxu1 %v802_v53  ;;  %v1114_v10 = vsub.f32 %v1094_v58, %v1113_v5 }
  0xec   :  { %809 = vmatmul.f32.vlgmr.msra.gmra.mxu2 %v808_v51  ;;  %v1315_v51 = vand.u32 4294901760, %v1314_v45 }
  0xed   :  { %988 = vmatpush.msra.mxu1 %v987_v57  ;;  %v830_v0 = vand.u32 4294901760, %v829_v61  ;;  %v593_v1 = vadd.f32 %v592_v56, %v562_v62  ;;  %856 = vmatpush.msrb.mxu0 %v829_v61  ;;  %v1115_v13 = vand.u32 4294901760, %v1114_v10  ;;  %v777_v62 = vstv %s3126_s5 }
  0xee   :  { %859 = vmatmul.f32.vlgmr.msrb.gmra.mxu0 %v805_v28  ;;  %v1296_v28 = vsub.f32 %v210_v23, %v3121_v25  ;;  %v1316_v56 = vsub.f32 %v1314_v45, %v1315_v51 }
  0xef   :  { %v831_v3 = vsub.f32 %v829_v61, %v830_v0  ;;  %v620_v4 = vadd.f32 %v619_v63, %v593_v1  ;;  %958 = vmatpush.msra.mxu0 %v3094_v30  ;;  %905 = vmatpush.msrb.mxu2 %v830_v0  ;;  %v1116_v15 = vsub.f32 %v1114_v10, %v1115_v13 }
  0xf0   :  { %883 = vmatmul.f32.vlgmr.msrb.gmra.mxu1 %v806_v36  ;;  %v1297_v34 = vand.u32 4294901760, %v1296_v28  ;;  %v1270_v36 = vand.u32 4294901760, %v208_v32  ;;  %v1317_v61 = vand.u32 4294901760, %v1316_v56 }
  0xf1   :  { %1060 = vmatpush.msrb.mxu0 %v985_v38  ;;  %v1111_v6 = vand.u32 4294901760, %v620_v4  ;;  %1011 = vmatpush.msra.mxu2 %v984_v33  ;;  %v832_v7 = vand.u32 4294901760, %v831_v3  ;;  %v1117_v16 = vand.u32 4294901760, %v1116_v15 }
  0xf2   :  { %1082 = vmatpush.msrb.mxu1 %v3094_v30  ;;  %v1298_v40 = vsub.f32 %v1296_v28, %v1297_v34  ;;  %v1308_v42 = vsub.f32 %v208_v32, %v1270_v36 }
  0xf3   :  { %v1138_v9 = vsub.f32 %v620_v4, %v1111_v6  ;;  %833 = vmatpush.msra.mxu3 %v832_v7 }
  0xf4   :  { %835 = vmatmul.f32.vlgmr.msra.gmra.mxu3 %v3089_v20  ;;  %907 = vmatmul.f32.vlgmr.msrb.gmra.mxu2 %v3089_v20  ;;  %v1309_v50 = vand.u32 4294901760, %v1308_v42 }
  0xf5   :  { %v1139_v11 = vand.u32 4294901760, %v1138_v9  ;;  %927 = vmatpush.msrb.mxu3 %v802_v53  ;;  %1112 = vmatpush.msrb.mxu2 %v1111_v6 }
  0xf6   :  { %964 = vmatmul.f32.vlgmr.msra.gmra.mxu0 %v963_v8  ;;  %v1310_v55 = vsub.f32 %v1308_v42, %v1309_v50 }
  0xf7   :  { %1034 = vmatpush.msra.mxu3 %v3094_v30  ;;  %v1140_v12 = vsub.f32 %v1138_v9, %v1139_v11  ;;  %1165 = vmatpush.msra.mxu0 %v1138_v9  ;;  %v1268_v30 = vand.u32 4294901760, %v209_v26 }
  0xf8   :  { %990 = vmatmul.f32.vlgmr.msra.gmra.mxu1 %v3101_v41  ;;  %v1311_v60 = vand.u32 4294901760, %v1310_v55 }
  0xf9   :  { %1188 = vmatpush.msra.mxu1 %v1111_v6  ;;  %v1141_v14 = vand.u32 4294901760, %v1140_v12  ;;  %v1302_v35 = vsub.f32 %v209_v26, %v1268_v30 }
  0xfc   :  { %929 = vmatmul.f32.vlgmr.msrb.gmra.mxu3 %v3089_v20  ;;  %1014 = vmatmul.f32.vlgmr.msra.gmra.mxu2 %v960_v47  ;;  %v1299_v47 = vand.u32 4294901760, %v1298_v40 }
  0xfd   :  { %1142 = vmatpush.msrb.mxu3 %v1141_v14  ;;  %1214 = vmatpush.msra.mxu2 %v1139_v11 }
  0xfe   :  { %1062 = vmatmul.f32.vlgmr.msrb.gmra.mxu0 %v3101_v41 }
  0xff   :  { %1267 = vmatpush.msrb.mxu0 %v3121_v25 }
 0x100   :  { %1084 = vmatmul.f32.vlgmr.msrb.gmra.mxu1 %v3101_v41  ;;  %v1303_v41 = vand.u32 4294901760, %v1302_v35 }
 0x101   :  { %1269 = vmatpush.msrb.mxu0 %v1268_v30  ;;  %1300 = vmatpush.msrb.mxu1 %v1299_v47 }
 0x102   :  { %v1304_v48 = vsub.f32 %v1302_v35, %v1303_v41 }
 0x103   :  { %1271 = vmatpush.msrb.mxu0 %v1270_v36 }
 0x104   :  { %1038 = vmatmul.f32.vlgmr.msra.gmra.mxu3 %v961_v59  ;;  %1118 = vmatmul.f32.vlgmr.msrb.gmra.mxu2 %v1117_v16  ;;  %v1305_v53 = vand.u32 4294901760, %v1304_v48 }
 0x105   :  { %1236 = vmatpush.msra.mxu3 %v1111_v6  ;;  %1338 = vmatpush.msrb.mxu2 %v1296_v28  ;;  %v2897_v6 = vmov 4.0  }
 0x106   :  { %1168 = vmatmul.f32.vlgmr.msra.gmra.mxu0 %v1114_v10  ;;  %1306 = vmatpush.msrb.mxu1 %v1305_v53  ;;  %2625 = vrcp.f32 %v2897_v6 }
 0x107   :  { %1341 = vmatpush.msrb.mxu2 %v1302_v35  ;;  %1273 = vmatpush.msrb.mxu0 %v1272_v39 }
 0x108   :  { %1192 = vmatmul.f32.vlgmr.msra.gmra.mxu1 %v1115_v13 }
 0x109   :  { %1344 = vmatpush.msrb.mxu2 %v1308_v42  ;;  %1396 = vmatpush.msra.mxu0 %v1297_v34  ;;  %v2898_v34 = vmov 7.0  }
 0x10a   :  { %1312 = vmatpush.msrb.mxu1 %v1311_v60  ;;  %2627 = vrcp.f32 %v2898_v34 }
 0x10b   :  { %1347 = vmatpush.msrb.mxu2 %v1314_v45  ;;  %1400 = vmatpush.msra.mxu0 %v1303_v41 }
 0x10c   :  { %1144 = vmatmul.f32.vlgmr.msrb.gmra.mxu3 %v1113_v5  ;;  %1216 = vmatmul.f32.vlgmr.msra.gmra.mxu2 %v1113_v5  ;;  %v3143_v15 = vpop.eup %2625 }
 0x10d   :  { %1367 = vmatpush.msrb.mxu3 %v3121_v25  ;;  %1404 = vmatpush.msra.mxu0 %v1309_v50  ;;  %vm2068_vm11 = vweird.f32 %v3143_v15 }
 0x10e   :  { %1318 = vmatpush.msrb.mxu1 %v1317_v61 }
 0x10f   :  { %1369 = vmatpush.msrb.mxu3 %v1268_v30  ;;  %1408 = vmatpush.msra.mxu0 %v1315_v51 }
 0x110   :  { %1427 = vmatpush.msra.mxu1 %v3121_v25  ;;  %v3159_v56 = vpop.eup %2627 }
 0x111   :  { %1371 = vmatpush.msrb.mxu3 %v1270_v36  ;;  %vm2100_vm13 = vweird.f32 %v3159_v56 }
 0x112   :  { %1429 = vmatpush.msra.mxu1 %v1268_v30 }
 0x113   :  { %1373 = vmatpush.msrb.mxu3 %v1272_v39 }
 0x114   :  { %1238 = vmatmul.f32.vlgmr.msra.gmra.mxu3 %v1113_v5  ;;  %1431 = vmatpush.msra.mxu1 %v1270_v36 }
 0x116   :  { %1433 = vmatpush.msra.mxu1 %v1272_v39 }
 0x155   :  { %v653_v18 = vpop.f32.mrf.mxu0 }
 0x156   :  { %v654_v19 = vadd.f32 %v3118_v17, %v653_v18  ;;  %v934_v18 = vstv %s3139_s7 }
 0x15b   :  { %v727_v31 = vpop.f32.mrf.mxu3 }
 0x15d   :  { %v679_v20 = vpop.f32.mrf.mxu1  ;;  %v703_v22 = vpop.f32.mrf.mxu2 }
 0x15e   :  { %v680_v21 = vadd.f32 %v679_v20, %v654_v19  ;;  %v751_v24 = vpop.f32.mrf.mxu0  ;;  %v2064_v20 = vmul.f32 4.0, %v3143_v15 }
 0x160   :  { %v704_v27 = vadd.f32 %v703_v22, %v680_v21 }
 0x162   :  { %v728_v38 = vadd.f32 %v727_v31, %v704_v27  ;;  %v2065_v27 = vsub.f32 1.0, %v2064_v20 }
 0x164   :  { %v752_v49 = vadd.f32 %v751_v24, %v728_v38  ;;  %v2066_v35 = vmul.f32 %v3143_v15, %v2065_v27 }
 0x165   :  { %v773_v33 = vpop.f32.mrf.mxu1 }
 0x166   :  { %v774_v59 = vadd.f32 %v773_v33, %v752_v49 }
 0x168   :  { %v778_v58 = vmul.f32 %v777_v62, %v774_v59  ;;  %vm776_vm2 = vcmp.gt.f32.partialorder %v774_v59, 0.0 }
 0x16a   :  { %v3137_v7 = vsel %vm776_vm2, %v774_v59, %v778_v58  ;;  %vm2321_vm2 = vcmask 254976  }
 0x16b   :  { %v860_v44 = vpop.f32.mrf.mxu0  ;;  %v2056_v12 = vsel %vm2055_vm3, %v3137_v7, 0.0  ;;  %v2082_v36 = vrot.slane %v3137_v7, 3  ;;  %v2119_v37 = vrot.slane %v3137_v7, 6  ;;  %v2124_v40 = vrot.slane %v3137_v7, 7 }
 0x16c   :  { %v2057_v16 = vrot.slane %v2056_v12, 4 }
 0x16d   :  { %v884_v54 = vpop.f32.mrf.mxu1 }
 0x16e   :  { %v2058_v21 = vadd.f32 %v2057_v16, %v2056_v12 }
 0x16f   :  { %v810_v43 = vpop.f32.mrf.mxu2 }
 0x170   :  { %v811_v57 = vadd.f32 %v3131_v46, %v810_v43  ;;  %v2059_v30 = vrot.slane %v2058_v21, 2 }
 0x172   :  { %v2060_v39 = vadd.f32 %v2059_v30, %v2058_v21 }
 0x173   :  { %v965_v2 = vpop.f32.mrf.mxu0 }
 0x174   :  { %v966_v5 = vadd.f32 %v3118_v17, %v965_v2  ;;  %v2061_v58 = vrot.slane %v2060_v39, 1 }
 0x175   :  { %v991_v8 = vpop.f32.mrf.mxu1 }
 0x176   :  { %v992_v14 = vadd.f32 %v991_v8, %v966_v5  ;;  %v2062_v16 = vadd.f32 %v2061_v58, %v2060_v39 }
 0x177   :  { %v836_v63 = vpop.f32.mrf.mxu3  ;;  %v908_v0 = vpop.f32.mrf.mxu2 }
 0x178   :  { %v837_v1 = vadd.f32 %v836_v63, %v811_v57 }
 0x17a   :  { %v861_v3 = vadd.f32 %v860_v44, %v837_v1 }
 0x17b   :  { %v1063_v19 = vpop.f32.mrf.mxu0 }
 0x17c   :  { %v885_v4 = vadd.f32 %v884_v54, %v861_v3 }
 0x17d   :  { %v1085_v23 = vpop.f32.mrf.mxu1 }
 0x17e   :  { %v909_v9 = vadd.f32 %v908_v0, %v885_v4 }
 0x17f   :  { %v930_v10 = vpop.f32.mrf.mxu3  ;;  %v1015_v11 = vpop.f32.mrf.mxu2 }
 0x180   :  { %v931_v13 = vadd.f32 %v930_v10, %v909_v9  ;;  %v1016_v17 = vadd.f32 %v1015_v11, %v992_v14  ;;  %v2096_v10 = vmul.f32 7.0, %v3159_v56  ;;  %v2067_v11 = vadd.f32 %v3143_v15, %v2066_v35 }
 0x182   :  { %v935_v24 = vmul.f32 %v934_v18, %v931_v13  ;;  %vm933_vm4 = vcmp.gt.f32.partialorder %v931_v13, 0.0 }
 0x183   :  { %v1169_v43 = vpop.f32.mrf.mxu0 }
 0x184   :  { %v3149_v31 = vsel %vm933_vm4, %v931_v13, %v935_v24  ;;  %vm2354_vm4 = vcmask 5120  }
 0x185   :  { %v2088_v41 = vsel %vm2087_vm5, %v3149_v31, 0.0  ;;  %v1193_v50 = vpop.f32.mrf.mxu1 }
 0x186   :  { %v2089_v51 = vrot.slane %v2088_v41, 4 }
 0x187   :  { %v1039_v22 = vpop.f32.mrf.mxu3  ;;  %v1119_v26 = vpop.f32.mrf.mxu2 }
 0x188   :  { %v1040_v25 = vadd.f32 %v1039_v22, %v1016_v17  ;;  %v1120_v33 = vadd.f32 %v3131_v46, %v1119_v26  ;;  %v2090_v4 = vadd.f32 %v2089_v51, %v2088_v41  ;;  %v2097_v22 = vsub.f32 1.0, %v2096_v10 }
 0x189   :  { %v2113_v26 = vrot.slane %v3149_v31, 7 }
 0x18a   :  { %v1064_v28 = vadd.f32 %v1063_v19, %v1040_v25  ;;  %v2091_v17 = vrot.slane %v2090_v4, 2 }
 0x18c   :  { %v1086_v32 = vadd.f32 %v1085_v23, %v1064_v28  ;;  %v2069_v23 = vsel %vm2068_vm11, %v3143_v15, %v2067_v11 }
 0x18d   :  { %v2070_v34 = vmul.f32 %v2069_v23, %v2062_v16  ;;  %v3207_v16 = vld [vmem:[%s3362_s9] ss:$0 sm:$0xff]  ;;  %s2899_s9 = smov [#allocation20]  }
 0x18e   :  { %vm1088_vm6 = vcmp.gt.f32.partialorder %v1086_v32, 0.0  ;;  %v1089_v38 = vmul.f32 %v1086_v32, %v777_v62  ;;  %s2573_s22 = sshll.u32 %s2899_s9, 4  ;;  %s2574_s22 = int_to_ptr.vmem [resolvable:$true] %s2573_s22 }
 0x18f   :  { %v1145_v42 = vpop.f32.mrf.mxu3  ;;  %v1217_v59 = vpop.f32.mrf.mxu2 }
 0x190   :  { %v1090_v44 = vsel %vm1088_vm6, %v1086_v32, %v1089_v38  ;;  %v1146_v45 = vadd.f32 %v1145_v42, %v1120_v33  ;;  %v2092_v32 = vadd.f32 %v2091_v17, %v2090_v4 }
 0x191   :  { %v1246_v46 = vrot.slane %v1090_v44, 4  ;;  %v2071_v47 = vsel %vm2055_vm3, %v1090_v44, 0.0  ;;  %v2084_v48 = vrot.slane %v1090_v44, 2  ;;  %v2121_v49 = vrot.slane %v1090_v44, 5 }
 0x192   :  { %v2072_v53 = vrot.slane %v2071_v47, 4  ;;  %v2126_v54 = vrot.slane %v1090_v44, 6  ;;  %v1170_v55 = vadd.f32 %v1169_v43, %v1146_v45  ;;  %v2093_v39 = vrot.slane %v2092_v32, 1 }
 0x193   :  { %v2123_v57 = vsel %vm2079_vm7, %v2119_v37, %v2121_v49  ;;  %v1249_v60 = vsel %vm1248_vm8, %v3137_v7, %v1246_v46  ;;  %v2086_v61 = vsel %vm2079_vm7, %v2082_v36, %v2084_v48  ;;  %v2098_v36 = vmul.f32 %v3159_v56, %v2097_v22 }
 0x194   :  { %v2073_v62 = vadd.f32 %v2072_v53, %v2071_v47  ;;  %v2128_v63 = vsel %vm2079_vm7, %v2124_v40, %v2126_v54  ;;  %v1194_v0 = vadd.f32 %v1193_v50, %v1170_v55  ;;  %v1252_v1 = vsel %vm1250_vm9, %v1249_v60, 0 }
 0x195   :  { %v2357_v2 = vrot.slane %v2128_v63, 6  ;;  %v1274_v3 = vand.u32 4294901760, %v1252_v1  ;;  %v2130_v31 = vmul.f32 0.9, %v2086_v61  ;;  %v2099_v41 = vadd.f32 %v3159_v56, %v2098_v36 }
 0x196   :  { %v2074_v5 = vrot.slane %v2073_v62, 2  ;;  %v1218_v6 = vadd.f32 %v1217_v59, %v1194_v0  ;;  %v2094_v44 = vadd.f32 %v2093_v39, %v2092_v32  ;;  %vm2558_vm3 = vcmask 257026  }
 0x197   :  { %v1239_v8 = vpop.f32.mrf.mxu3  ;;  %1320 = vmatmul.f32.vlgmr.msrb.gmra.mxu1 %v1274_v3  ;;  %v1275_v9 = vsub.f32 %v1252_v1, %v1274_v3  ;;  %v3168_v7 = vsel %vm2351_vm10, %v2123_v57, %v2357_v2  ;;  %v2101_v46 = vsel %vm2100_vm13, %v3159_v56, %v2099_v41  ;;  %v1443_v56 = vsel %vm1442_vm14, %v3081_v52, 0 }
 0x198   :  { %v2075_v12 = vadd.f32 %v2074_v5, %v2073_v62  ;;  %v1240_v13 = vadd.f32 %v1239_v8, %v1218_v6  ;;  %v2102_v48 = vmul.f32 %v2101_v46, %v2094_v44  ;;  %v1465_v57 = vand.u32 4294901760, %v1443_v56 }
 0x199   :  { %1350 = vmatmul.f32.vlgmr.msrb.gmra.mxu2 %v1275_v9  ;;  %v1276_v14 = vand.u32 4294901760, %v1275_v9 }
 0x19a   :  { %v2076_v19 = vrot.slane %v2075_v12, 1  ;;  %vm1242_vm12 = vcmp.gt.f32.partialorder %v1240_v13, 0.0  ;;  %v1243_v20 = vmul.f32 %v1240_v13, %v934_v18  ;;  %v1466_v62 = vsub.f32 %v1443_v56, %v1465_v57 }
 0x19b   :  { %1377 = vmatmul.f32.vlgmr.msrb.gmra.mxu3 %v1276_v14  ;;  %v1277_v21 = vsub.f32 %v1275_v9, %v1276_v14 }
 0x19c   :  { %v1244_v24 = vsel %vm1242_vm12, %v1240_v13, %v1243_v20  ;;  %v2077_v25 = vadd.f32 %v2076_v19, %v2075_v12  ;;  %v1467_v1 = vand.u32 4294901760, %v1466_v62 }
 0x19d   :  { %v2103_v27 = vsel %vm2087_vm5, %v1244_v24, 0.0  ;;  %v2116_v28 = vrot.slane %v1244_v24, 6  ;;  %v1278_v30 = vand.u32 4294901760, %v1277_v21 }
 0x19e   :  { %v2104_v33 = vrot.slane %v2103_v27, 4  ;;  %v2078_v35 = vmul.f32 %v2077_v25, %v2069_v23  ;;  %v1468_v5 = vsub.f32 %v1466_v62, %v1467_v1 }
 0x19f   :  { %1279 = vmatmul.f32.vlgmr.msrb.gmra.mxu0 %v1278_v30  ;;  %1435 = vmatmul.f32.vlgmr.msra.gmra.mxu1 %v1274_v3  ;;  %v3179_v18 = vsel %vm2079_vm7, %v2113_v26, %v2116_v28 }
 0x1a0   :  { %v2105_v15 = vadd.f32 %v2104_v33, %v2103_v27  ;;  %v2080_v37 = vsel %vm2079_vm7, %v2070_v34, %v2078_v35  ;;  %v1469_v10 = vand.u32 4294901760, %v1468_v5  ;;  %v1595_v35 = vstv %s3211_s21 }
 0x1a1   :  { %v2129_v38 = vmul.f32 0.1, %v2080_v37 }
 0x1a2   :  { %v2106_v40 = vrot.slane %v2105_v15, 2 }
 0x1a3   :  { %v3184_v42 = vadd.f32 %v2130_v31, %v2129_v38 }
 0x1a4   :  { %v2107_v43 = vadd.f32 %v2106_v40, %v2105_v15  ;;  %v1749_v15 = vsel %vm1442_vm14, %v3092_v29, 0 }
 0x1a5   :  { %v1770_v31 = vand.u32 4294901760, %v1749_v15 }
 0x1a6   :  { %v2108_v45 = vrot.slane %v2107_v43, 1 }
 0x1a7   :  { %1410 = vmatmul.f32.vlgmr.msra.gmra.mxu0 %v1274_v3  ;;  %v1771_v44 = vsub.f32 %v1749_v15, %v1770_v31 }
 0x1a8   :  { %v2109_v47 = vadd.f32 %v2108_v45, %v2107_v43 }
 0x1aa   :  { %v2110_v49 = vmul.f32 %v2109_v47, %v2101_v46 }
 0x1ac   :  { %v3189_v50 = vsel %vm2079_vm7, %v2102_v48, %v2110_v49  ;;  %v1772_v48 = vand.u32 4294901760, %v1771_v44 }
 0x1ad   :  { %v2328_v51 = vrot.slane %v3189_v50, 7 }
 0x1af   :  { %v3194_v53 = vsel %vm2079_vm7, %v3189_v50, %v2328_v51  ;;  %v1773_v51 = vsub.f32 %v1771_v44, %v1772_v48 }
 0x1b0   :  { %v2337_v54 = vrot.slane %v3194_v53, 7 }
 0x1b1   :  { %v1774_v56 = vand.u32 4294901760, %v1773_v51 }
 0x1b2   :  { %v3199_v55 = vsel %vm2079_vm7, %v3194_v53, %v2337_v54 }
 0x214   :  { %v1321_v59 = vpop.f32.mrf.mxu1 }
 0x21c   :  { %v1280_v60 = vpop.f32.mrf.mxu0  ;;  %v1351_v63 = vpop.f32.mrf.mxu2 }
 0x21d   :  { %v1322_v61 = vadd.f32 %v1321_v59, %v1280_v60  ;;  %v1436_v6 = vpop.f32.mrf.mxu1 }
 0x21e   :  { %v1378_v58 = vpop.f32.mrf.mxu3 }
 0x21f   :  { %v1352_v0 = vadd.f32 %v1351_v63, %v1322_v61 }
 0x221   :  { %v1379_v2 = vadd.f32 %v1378_v58, %v1352_v0 }
 0x224   :  { %v1411_v3 = vpop.f32.mrf.mxu0 }
 0x225   :  { %v1412_v4 = vadd.f32 %v1411_v3, %v1379_v2 }
 0x227   :  { %v1437_v8 = vadd.f32 %v1436_v6, %v1412_v4 }
 0x229   :  { %v1446_v9 = vsel %vm1248_vm8, %v1437_v8, 0  ;;  %v1748_v19 = vrot.slane %v1437_v8, 4  ;;  %v219_v8 = vld [vmem:[#allocation15 + $0x18] sm:$0xff] }
 0x22a   :  { %v1463_v11 = vand.u32 4294901760, %v1446_v9 }
 0x22b   :  { %v1751_v21 = vsel %vm1248_vm8, %v1748_v19, 0 }
 0x22c   :  { %v1490_v52 = vsub.f32 %v1446_v9, %v1463_v11  ;;  %1464 = vmatpush.msra.mxu2 %v1463_v11  ;;  %1540 = vmatpush.msrb.mxu1 %v1463_v11  ;;  %v1768_v25 = vand.u32 4294901760, %v1751_v21 }
 0x22d   :  { %1470 = vmatmul.f32.vlgmr.msra.gmra.mxu2 %v1469_v10  ;;  %1544 = vmatmul.f32.vlgmr.msrb.gmra.mxu1 %v1467_v1  ;;  %v218_v10 = vld [vmem:[#allocation15 + $0x10] sm:$0xff] }
 0x22e   :  { %1517 = vmatpush.msrb.mxu0 %v1490_v52  ;;  %v1491_v12 = vand.u32 4294901760, %v1490_v52  ;;  %v1795_v32 = vsub.f32 %v1751_v21, %v1768_v25 }
 0x22f   :  { %1520 = vmatmul.f32.vlgmr.msrb.gmra.mxu0 %v1466_v62 }
 0x230   :  { %1566 = vmatpush.msrb.mxu2 %v1491_v12  ;;  %v1492_v13 = vsub.f32 %v1490_v52, %v1491_v12  ;;  %v1796_v37 = vand.u32 4294901760, %v1795_v32  ;;  %v217_v12 = vld [vmem:[#allocation15 + $0x8] sm:$0xff] }
 0x232   :  { %v1493_v14 = vand.u32 4294901760, %v1492_v13  ;;  %v1797_v41 = vsub.f32 %v1795_v32, %v1796_v37 }
 0x234   :  { %1494 = vmatpush.msra.mxu3 %v1493_v14  ;;  %v1798_v46 = vand.u32 4294901760, %v1797_v41  ;;  %v3223_v14 = vand.u32 4294901760, %v218_v10 }
 0x235   :  { %1496 = vmatmul.f32.vlgmr.msra.gmra.mxu3 %v1465_v57  ;;  %1568 = vmatmul.f32.vlgmr.msrb.gmra.mxu2 %v1465_v57 }
 0x236   :  { %1588 = vmatpush.msrb.mxu3 %v1463_v11  ;;  %v3221_v11 = vand.u32 4294901760, %v219_v8 }
 0x238   :  { %v3226_v21 = vsub.f32 %v219_v8, %v3221_v11 }
 0x23d   :  { %1590 = vmatmul.f32.vlgmr.msrb.gmra.mxu3 %v1465_v57 }
 0x2aa   :  { %v1545_v26 = vpop.f32.mrf.mxu1 }
 0x2ac   :  { %v1521_v23 = vpop.f32.mrf.mxu0 }
 0x2b0   :  { %v1471_v17 = vpop.f32.mrf.mxu2 }
 0x2b1   :  { %v1472_v20 = vadd.f32 %v3207_v16, %v1471_v17  ;;  %v216_v17 = vld [vmem:[#allocation15] sm:$0xff] }
 0x2b8   :  { %v1497_v22 = vpop.f32.mrf.mxu3  ;;  %v1569_v28 = vpop.f32.mrf.mxu2 }
 0x2b9   :  { %v1498_v24 = vadd.f32 %v1497_v22, %v1472_v20 }
 0x2bb   :  { %v1522_v27 = vadd.f32 %v1521_v23, %v1498_v24  ;;  %v3231_v24 = vsub.f32 %v218_v10, %v3223_v14 }
 0x2bd   :  { %v1546_v30 = vadd.f32 %v1545_v26, %v1522_v27  ;;  %v2178_v27 = vand.u32 4294901760, %v3226_v21 }
 0x2bf   :  { %v1570_v33 = vadd.f32 %v1569_v28, %v1546_v30  ;;  %v2179_v15 = vsub.f32 %v3226_v21, %v2178_v27 }
 0x2c0   :  { %v1591_v34 = vpop.f32.mrf.mxu3 }
 0x2c1   :  { %v1592_v36 = vadd.f32 %v1591_v34, %v1570_v33 }
 0x2c3   :  { %vm1594_vm15 = vcmp.gt.f32.partialorder %v1592_v36, 0.0  ;;  %v1596_v38 = vmul.f32 %v1595_v35, %v1592_v36 }
 0x2c5   :  { %v1597_v39 = vsel %vm1594_vm15, %v1592_v36, %v1596_v38  ;;  %v2133_v36 = vsel %vm1250_vm9, %v3179_v18, 0 }
 0x2c6   :  { %v1598_v40 = vmax.f32 %v1597_v39, 0.0  ;;  %v3251_v41 = vand.u32 4294901760, %v2133_v36 }
 0x2c8   :  { %v1600_v43 = vsel %vm1250_vm9, %v1598_v40, 0 }
 0x2c9   :  { %v1617_v45 = vand.u32 4294901760, %v1600_v43 }
 0x2cb   :  { %1618 = vmatpush.xpose.msra.mxu0 %v1617_v45  ;;  %1694 = vmatpush.xpose.msra.mxu3 %v1617_v45  ;;  %v1620_v47 = vsub.f32 %v1600_v43, %v1617_v45 }
 0x2cd   :  { %1671 = vmatpush.xpose.msra.mxu2 %v1620_v47  ;;  %v1621_v29 = vand.u32 4294901760, %v1620_v47 }
 0x2cf   :  { %1799 = vmatpush.msrb.mxu3 %v1798_v46  ;;  %1720 = vmatpush.xpose.msrb.mxu0 %v1621_v29  ;;  %v1622_v49 = vsub.f32 %v1620_v47, %v1621_v29 }
 0x2d0   :  { %1698 = vmatmul.f32.vlgmr.msra.gmra.mxu3 %v1621_v29  ;;  %1674 = vmatmul.f32.vlgmr.msra.gmra.mxu2 %v1620_v47  ;;  %v3261_v47 = vsub.f32 %v2133_v36, %v3251_v41 }
 0x2d1   :  { %1769 = vmatpush.msrb.mxu2 %v1768_v25  ;;  %1893 = vmatpush.msra.mxu3 %v1768_v25  ;;  %v1623_v54 = vand.u32 4294901760, %v1622_v49 }
 0x2d3   :  { %1871 = vmatpush.msra.mxu2 %v1796_v37  ;;  %1624 = vmatmul.f32.vlgmr.msra.gmra.mxu0 %v1623_v54 }
 0x2d4   :  { %1648 = vmatpush.xpose.msra.mxu1 %v1623_v54  ;;  %1822 = vmatpush.msra.mxu0 %v1795_v32  ;;  %v2184_v32 = vand.u32 4294901760, %v3231_v24  ;;  %v2157_v54 = vand.u32 4294901760, %v3261_v47 }
 0x2d6   :  { %v2185_v39 = vsub.f32 %v3231_v24, %v2184_v32 }
 0x2d7   :  { %1650 = vmatmul.f32.vlgmr.msra.gmra.mxu1 %v1617_v45 }
 0x2d8   :  { %1742 = vmatpush.xpose.msrb.mxu1 %v1617_v45  ;;  %1801 = vmatmul.f32.vlgmr.msrb.gmra.mxu3 %v1770_v31  ;;  %v2186_v18 = vand.u32 4294901760, %v2185_v39 }
 0x2d9   :  { %1775 = vmatmul.f32.vlgmr.msrb.gmra.mxu2 %v1774_v56 }
 0x2db   :  { %1722 = vmatmul.f32.vlgmr.msrb.gmra.mxu0 %v1617_v45 }
 0x2dc   :  { %1845 = vmatpush.msra.mxu1 %v1768_v25  ;;  %v3233_v25 = vand.u32 4294901760, %v216_v17 }
 0x2de   :  { %v3241_v33 = vsub.f32 %v216_v17, %v3233_v25 }
 0x2df   :  { %1744 = vmatmul.f32.vlgmr.msrb.gmra.mxu1 %v1617_v45 }
 0x2e0   :  { %1895 = vmatmul.f32.vlgmr.msra.gmra.mxu3 %v1770_v31  ;;  %v2196_v40 = vand.u32 4294901760, %v3241_v33 }
 0x2e1   :  { %1873 = vmatmul.f32.vlgmr.msra.gmra.mxu2 %v1770_v31 }
 0x2e2   :  { %v2197_v46 = vsub.f32 %v3241_v33, %v2196_v40 }
 0x2e3   :  { %1825 = vmatmul.f32.vlgmr.msra.gmra.mxu0 %v1771_v44  ;;  %v2180_v44 = vand.u32 4294901760, %v2179_v15 }
 0x2e4   :  { %v2198_v51 = vand.u32 4294901760, %v2197_v46 }
 0x2e7   :  { %1849 = vmatmul.f32.vlgmr.msra.gmra.mxu1 %v1772_v48 }
 0x350   :  { %v1625_v57 = vpop.f32.mrf.mxu0 }
 0x353   :  { %v1699_v59 = vpop.f32.mrf.mxu3  ;;  %v1675_v61 = vpop.f32.mrf.mxu2 }
 0x354   :  { %v1651_v60 = vpop.f32.mrf.mxu1 }
 0x355   :  { %v1652_v62 = vadd.f32 %v1651_v60, %v1625_v57  ;;  %v215_v57 = vld [vmem:[#allocation14 + $0x18] sm:$0xff]  ;;  %v2158_v60 = vsub.f32 %v3261_v47, %v2157_v54 }
 0x357   :  { %v1676_v63 = vadd.f32 %v1675_v61, %v1652_v62  ;;  %v214_v61 = vld [vmem:[#allocation14 + $0x10] sm:$0xff]  ;;  %v3272_v62 = vand.u32 4294901760, %v215_v57 }
 0x358   :  { %v1723_v1 = vpop.f32.mrf.mxu0 }
 0x359   :  { %v1700_v0 = vadd.f32 %v1699_v59, %v1676_v63  ;;  %v213_v63 = vld [vmem:[#allocation14 + $0x8] sm:$0xff] }
 0x35b   :  { %v1724_v58 = vadd.f32 %v1723_v1, %v1700_v0  ;;  %v1802_v2 = vpop.f32.mrf.mxu3  ;;  %v3278_v0 = vand.u32 4294901760, %v214_v61  ;;  %v2159_v1 = vand.u32 4294901760, %v2158_v60 }
 0x35c   :  { %v1745_v3 = vpop.f32.mrf.mxu1  ;;  %v1776_v4 = vpop.f32.mrf.mxu2 }
 0x35d   :  { %v1746_v5 = vadd.f32 %v1745_v3, %v1724_v58  ;;  %v1777_v6 = vadd.f32 %v3207_v16, %v1776_v4  ;;  %v3228_v16 = vand.u32 4294901760, %v217_v12  ;;  %v212_v58 = vld [vmem:[#allocation14] sm:$0xff]  ;;  %v2405_v3 = vsub.f32 %v215_v57, %v3272_v62 }
 0x35e   :  { %v3286_v4 = vand.u32 4294901760, %v213_v63 }
 0x35f   :  { %2053 = vst.msk [vmem:[#allocation20] sm:$0xf] %vm2052_vm0, %v1746_v5  ;;  %v1803_v9 = vadd.f32 %v1802_v2, %v1777_v6  ;;  %v3237_v28 = vsub.f32 %v217_v12, %v3228_v16  ;;  %v2361_v2 = vsel %vm1250_vm9, %v3168_v7, 0  ;;  %v2411_v5 = vsub.f32 %v214_v61, %v3278_v0 }
 0x360   :  { %v1826_v52 = vpop.f32.mrf.mxu0  ;;  %v3291_v6 = vand.u32 4294901760, %v212_v58  ;;  %v3293_v8 = vand.u32 4294901760, %v2361_v2  ;;  %v2417_v7 = vsub.f32 %v213_v63, %v3286_v4 }
 0x361   :  { %v1827_v13 = vadd.f32 %v1826_v52, %v1803_v9  ;;  %v2190_v37 = vand.u32 4294901760, %v3237_v28  ;;  %v2406_v9 = vand.u32 4294901760, %v2405_v3 }
 0x362   :  { %v2423_v10 = vsub.f32 %v212_v58, %v3291_v6  ;;  %v2384_v52 = vsub.f32 %v2361_v2, %v3293_v8 }
 0x363   :  { %v1896_v23 = vpop.f32.mrf.mxu3  ;;  %v2407_v12 = vsub.f32 %v2405_v3, %v2406_v9 }
 0x364   :  { %v1850_v19 = vpop.f32.mrf.mxu1  ;;  %v1874_v20 = vpop.f32.mrf.mxu2  ;;  %v2385_v17 = vand.u32 4294901760, %v2384_v52 }
 0x365   :  { %v1851_v22 = vadd.f32 %v1850_v19, %v1827_v13  ;;  %v2418_v13 = vand.u32 4294901760, %v2417_v7 }
 0x367   :  { %v1875_v26 = vadd.f32 %v1874_v20, %v1851_v22  ;;  %v2424_v20 = vand.u32 4294901760, %v2423_v10  ;;  %v2386_v22 = vsub.f32 %v2384_v52, %v2385_v17 }
 0x369   :  { %v1897_v30 = vadd.f32 %v1896_v23, %v1875_v26  ;;  %v2425_v23 = vsub.f32 %v2423_v10, %v2424_v20 }
 0x36b   :  { %vm1899_vm1 = vcmp.gt.f32.partialorder %v1897_v30, 0.0  ;;  %v1900_v34 = vmul.f32 %v1897_v30, %v1595_v35  ;;  %v2191_v35 = vsub.f32 %v3237_v28, %v2190_v37  ;;  %v2426_v26 = vand.u32 4294901760, %v2425_v23 }
 0x36d   :  { %v1901_v38 = vsel %vm1899_vm1, %v1897_v30, %v1900_v34  ;;  %v2192_v29 = vand.u32 4294901760, %v2191_v35 }
 0x36e   :  { %v1902_v31 = vmax.f32 %v1901_v38, 0.0 }
 0x370   :  { %v1904_v43 = vsel %vm1250_vm9, %v1902_v31, 0 }
 0x371   :  { %v3255_v45 = vand.u32 4294901760, %v1904_v43 }
 0x373   :  { %1922 = vmatpush.xpose.msrb.mxu0 %v3255_v45  ;;  %1998 = vmatpush.xpose.msrb.mxu3 %v3255_v45  ;;  %v1924_v48 = vsub.f32 %v1904_v43, %v3255_v45 }
 0x375   :  { %1975 = vmatpush.xpose.msrb.mxu2 %v1924_v48  ;;  %v1925_v49 = vand.u32 4294901760, %v1924_v48 }
 0x377   :  { %2181 = vmatpush.msra.mxu3 %v2180_v44  ;;  %2024 = vmatpush.xpose.msra.mxu0 %v1925_v49  ;;  %v1926_v56 = vsub.f32 %v1924_v48, %v1925_v49 }
 0x378   :  { %2002 = vmatmul.f32.vlgmr.msrb.gmra.mxu3 %v1925_v49  ;;  %1978 = vmatmul.f32.vlgmr.msrb.gmra.mxu2 %v1924_v48 }
 0x379   :  { %2148 = vmatpush.msra.mxu2 %v3221_v11  ;;  %2187 = vmatpush.msra.mxu3 %v2186_v18  ;;  %v1927_v59 = vand.u32 4294901760, %v1926_v56 }
 0x37b   :  { %2193 = vmatpush.msra.mxu3 %v2192_v29  ;;  %2150 = vmatpush.msra.mxu2 %v3223_v14 }
 0x37c   :  { %1928 = vmatmul.f32.vlgmr.msrb.gmra.mxu0 %v1927_v59  ;;  %1952 = vmatpush.xpose.msrb.mxu1 %v1927_v59 }
 0x37d   :  { %2199 = vmatpush.msra.mxu3 %v2198_v51  ;;  %2152 = vmatpush.msra.mxu2 %v3228_v16 }
 0x37e   :  { %2219 = vmatpush.msrb.mxu0 %v3226_v21  ;;  %v2419_v21 = vsub.f32 %v2417_v7, %v2418_v13 }
 0x37f   :  { %2308 = vmatpush.msrb.mxu3 %v3221_v11  ;;  %1954 = vmatmul.f32.vlgmr.msrb.gmra.mxu1 %v3255_v45 }
 0x380   :  { %2046 = vmatpush.xpose.msra.mxu1 %v3255_v45  ;;  %2154 = vmatpush.msra.mxu2 %v3233_v25 }
 0x381   :  { %2201 = vmatmul.f32.vlgmr.msra.gmra.mxu3 %v3251_v41  ;;  %2160 = vmatmul.f32.vlgmr.msra.gmra.mxu2 %v2159_v1 }
 0x382   :  { %2277 = vmatpush.msrb.mxu2 %v2178_v27  ;;  %2310 = vmatpush.msrb.mxu3 %v3223_v14 }
 0x383   :  { %2222 = vmatpush.msrb.mxu0 %v3231_v24  ;;  %v2420_v24 = vand.u32 4294901760, %v2419_v21 }
 0x384   :  { %2281 = vmatpush.msrb.mxu2 %v2184_v32  ;;  %2312 = vmatpush.msrb.mxu3 %v3228_v16 }
 0x385   :  { %2248 = vmatpush.msrb.mxu1 %v3221_v11  ;;  %2026 = vmatmul.f32.vlgmr.msra.gmra.mxu0 %v3255_v45  ;;  %v2412_v11 = vand.u32 4294901760, %v2411_v5 }
 0x386   :  { %2285 = vmatpush.msrb.mxu2 %v2190_v37  ;;  %2314 = vmatpush.msrb.mxu3 %v3233_v25 }
 0x387   :  { %2225 = vmatpush.msrb.mxu0 %v3237_v28  ;;  %2048 = vmatmul.f32.vlgmr.msra.gmra.mxu1 %v3255_v45  ;;  %v2413_v19 = vsub.f32 %v2411_v5, %v2412_v11 }
 0x388   :  { %2289 = vmatpush.msrb.mxu2 %v2196_v40  ;;  %2476 = vmatpush.msra.mxu3 %v3272_v62 }
 0x389   :  { %2316 = vmatmul.f32.vlgmr.msrb.gmra.mxu3 %v3251_v41  ;;  %2250 = vmatpush.msrb.mxu1 %v3223_v14  ;;  %v2408_v14 = vand.u32 4294901760, %v2407_v12  ;;  %v2325_v12 = vstv %s2604_s27 }
 0x38a   :  { %2447 = vmatpush.msra.mxu2 %v2405_v3  ;;  %2228 = vmatpush.msrb.mxu0 %v3241_v33  ;;  %v2555_v3 = vrot.slane %v3184_v42, 6 }
 0x38b   :  { %2291 = vmatmul.f32.vlgmr.msrb.gmra.mxu2 %v3251_v41  ;;  %2478 = vmatpush.msra.mxu3 %v3278_v0 }
 0x38c   :  { %2252 = vmatpush.msrb.mxu1 %v3228_v16  ;;  %2450 = vmatpush.msra.mxu2 %v2411_v5  ;;  %v2414_v16 = vand.u32 4294901760, %v2413_v19 }
 0x38d   :  { %2376 = vmatpush.msra.mxu0 %v3272_v62  ;;  %2480 = vmatpush.msra.mxu3 %v3286_v4 }
 0x38e   :  { %2231 = vmatmul.f32.vlgmr.msrb.gmra.mxu0 %v3261_v47  ;;  %2254 = vmatpush.msrb.mxu1 %v3233_v25  ;;  %v2387_v25 = vand.u32 4294901760, %v2386_v22 }
 0x38f   :  { %2453 = vmatpush.msra.mxu2 %v2417_v7  ;;  %2378 = vmatpush.msra.mxu0 %v3278_v0  ;;  %v2552_v7 = vstv %s223_s26 }
 0x390   :  { %2482 = vmatpush.msra.mxu3 %v3291_v6  ;;  %2258 = vmatmul.f32.vlgmr.msrb.gmra.mxu1 %v2157_v54 }
 0x391   :  { %2456 = vmatpush.msra.mxu2 %v2423_v10  ;;  %2409 = vmatpush.msra.mxu1 %v2408_v14 }
 0x392   :  { %2486 = vmatmul.f32.vlgmr.msra.gmra.mxu3 %v2385_v17  ;;  %2380 = vmatpush.msra.mxu0 %v3286_v4 }
 0x393   :  { %2459 = vmatmul.f32.vlgmr.msra.gmra.mxu2 %v2384_v52  ;;  %2415 = vmatpush.msra.mxu1 %v2414_v16 }
 0x394   :  { %2382 = vmatpush.msra.mxu0 %v3291_v6 }
 0x395   :  { %2421 = vmatpush.msra.mxu1 %v2420_v24 }
 0x396   :  { %2388 = vmatmul.f32.vlgmr.msra.gmra.mxu0 %v2387_v25 }
 0x397   :  { %2505 = vmatpush.msrb.mxu0 %v2406_v9  ;;  %2427 = vmatpush.msra.mxu1 %v2426_v26 }
 0x398   :  { %2429 = vmatmul.f32.vlgmr.msra.gmra.mxu1 %v3293_v8 }
 0x399   :  { %2509 = vmatpush.msrb.mxu0 %v2412_v11  ;;  %2536 = vmatpush.msrb.mxu1 %v3272_v62 }
 0x39b   :  { %2513 = vmatpush.msrb.mxu0 %v2418_v13  ;;  %2538 = vmatpush.msrb.mxu1 %v3278_v0 }
 0x39d   :  { %2517 = vmatpush.msrb.mxu0 %v2424_v20  ;;  %2540 = vmatpush.msrb.mxu1 %v3286_v4 }
 0x39e   :  { %2519 = vmatmul.f32.vlgmr.msrb.gmra.mxu0 %v3293_v8 }
 0x39f   :  { %2542 = vmatpush.msrb.mxu1 %v3291_v6 }
 0x3a0   :  { %2544 = vmatmul.f32.vlgmr.msrb.gmra.mxu1 %v3293_v8 }
 0x3f9   :  { %v1929_v27 = vpop.f32.mrf.mxu0 }
 0x3fb   :  { %v2003_v28 = vpop.f32.mrf.mxu3  ;;  %v1979_v32 = vpop.f32.mrf.mxu2 }
 0x3fc   :  { %v1955_v30 = vpop.f32.mrf.mxu1 }
 0x3fd   :  { %v1956_v33 = vadd.f32 %v1955_v30, %v1929_v27 }
 0x3ff   :  { %v1980_v34 = vadd.f32 %v1979_v32, %v1956_v33 }
 0x401   :  { %v2004_v36 = vadd.f32 %v2003_v28, %v1980_v34 }
 0x402   :  { %v2027_v15 = vpop.f32.mrf.mxu0 }
 0x403   :  { %v2028_v37 = vadd.f32 %v2027_v15, %v2004_v36 }
 0x404   :  { %v2202_v38 = vpop.f32.mrf.mxu3  ;;  %v2049_v31 = vpop.f32.mrf.mxu1 }
 0x405   :  { %v2161_v39 = vpop.f32.mrf.mxu2  ;;  %v2050_v40 = vadd.f32 %v2049_v31, %v2028_v37 }
 0x406   :  { %v2203_v41 = vadd.f32 %v2202_v38, %v2161_v39 }
 0x407   :  { %2054 = vst.msk [vmem:[#allocation20 + $0x4] sm:$0xf] %vm2052_vm0, %v2050_v40 }
 0x408   :  { %2581 = dma.vmem_to_hbm [thread:$0]  %s2574_s22, 128, %s2576_s8, [#allocation4], %s2900_s10, %s2900_s10, %s2901_s25  }
 0x40b   :  { %v2232_v43 = vpop.f32.mrf.mxu0 }
 0x40c   :  { %v2233_v44 = vadd.f32 %v2232_v43, %v2203_v41  ;;  %v2317_v46 = vpop.f32.mrf.mxu3 }
 0x40d   :  { %v2259_v35 = vpop.f32.mrf.mxu1 }
 0x40e   :  { %v2292_v45 = vpop.f32.mrf.mxu2  ;;  %v2260_v18 = vadd.f32 %v2259_v35, %v2233_v44 }
 0x410   :  { %v2293_v47 = vadd.f32 %v2292_v45, %v2260_v18 }
 0x412   :  { %v2318_v48 = vadd.f32 %v2317_v46, %v2293_v47 }
 0x413   :  { %v2389_v29 = vpop.f32.mrf.mxu0 }
 0x414   :  { %v2331_v49 = vmul.f32 %v3194_v53, %v2318_v48  ;;  %v2340_v63 = vmul.f32 %v3199_v55, %v2318_v48  ;;  %v2320_v55 = vmul.f32 %v2318_v48, %v3189_v50 }
 0x415   :  { %v2430_v51 = vpop.f32.mrf.mxu1  ;;  %v2487_v60 = vpop.f32.mrf.mxu3 }
 0x416   :  { %v2431_v54 = vadd.f32 %v2430_v51, %v2389_v29  ;;  %v2332_v56 = vsel %vm2321_vm2, %v2331_v49, 0.0  ;;  %v2460_v57 = vpop.f32.mrf.mxu2  ;;  %v2341_v2 = vsel %vm2321_vm2, %v2340_v63, 0.0 }
 0x417   :  { %2333 = vadd.xlane.f32.xlu0 %v2332_v56 }
 0x418   :  { %v2461_v59 = vadd.f32 %v2460_v57, %v2431_v54 }
 0x41a   :  { %v2488_v61 = vadd.f32 %v2487_v60, %v2461_v59 }
 0x41b   :  { %v2520_v62 = vpop.f32.mrf.mxu0 }
 0x41c   :  { %v2521_v0 = vadd.f32 %v2520_v62, %v2488_v61 }
 0x41d   :  { %v2545_v1 = vpop.f32.mrf.mxu1 }
 0x41e   :  { %v2546_v58 = vadd.f32 %v2545_v1, %v2521_v0 }
 0x41f   :  { %2342 = vadd.xlane.f32.xlu0 %v2341_v2 }
 0x420   :  { %v2557_v53 = vmul.f32 %v2555_v3, %v2546_v58  ;;  %v2548_v4 = vmul.f32 %v2546_v58, %v3184_v42  ;;  %v2322_v42 = vsel %vm2321_vm2, %v2320_v55, 0.0 }
 0x422   :  { %v2559_v5 = vsel %vm2558_vm3, %v2557_v53, 0.0  ;;  %v2549_v6 = vsel %vm2321_vm2, %v2548_v4, 0.0 }
 0x423   :  { %2560 = vadd.xlane.f32.xlu1 %v2559_v5  ;;  %2550 = vadd.xlane.f32.xlu2 %v2549_v6 }
 0x42b   :  { %2323 = vadd.xlane.f32.xlu1 %v2322_v42 }
 0x48a   :  { %v2334_v8 = vpop.xlane.xlu0 %2333 }
 0x48b   :  { %v2335_v20 = vadd.f32 %v2334_v8, %v2325_v12 }
 0x48d   :  { %v2346_v16 = vrot.slane %v2335_v20, 6 }
 0x492   :  { %v2343_v13 = vpop.xlane.xlu0 %2342 }
 0x493   :  { %v2344_v14 = vadd.f32 %v2343_v13, %v2325_v12 }
 0x495   :  { %v2349_v23 = vrot.slane %v2344_v14, 4 }
 0x496   :  { %v2561_v9 = vpop.xlane.xlu1 %2560  ;;  %v2551_v10 = vpop.xlane.xlu2 %2550 }
 0x497   :  { %v2562_v52 = vadd.f32 %v2561_v9, %v2552_v7  ;;  %v2553_v11 = vadd.f32 %v2552_v7, %v2551_v10 }
 0x499   :  { %v2564_v17 = vrot.slane %v2562_v52, 6  ;;  %v2566_v19 = vsel %vm2351_vm10, %v2553_v11, %v2562_v52 }
 0x49b   :  { %v2567_v50 = vsel %vm1248_vm8, %v2566_v19, %v2564_v17 }
 0x49c   :  { %2568 = vst.msk [vmem:[%s3368_s15] sm:$0x3f] %vm2354_vm4, %v2567_v50 }
 0x49e   :  { %v2324_v21 = vpop.xlane.xlu1 %2323 }
 0x49f   :  { %v2326_v22 = vadd.f32 %v2325_v12, %v2324_v21 }
 0x4a1   :  { %v2352_v24 = vsel %vm2351_vm10, %v2326_v22, %v2346_v16 }
 0x4a2   :  { %v2353_v25 = vsel %vm1248_vm8, %v2352_v24, %v2349_v23 }
 0x4a3   :  { %2355 = vst.msk [vmem:[%s3369_s16] sm:$0x3f] %vm2354_vm4, %v2353_v25 }
 0x4a4   :  { %2883 = dma.done.wait [#allocation4], 128  }
 0x4a5   :  { %2884 = vsyncadd [#allocation4], 4294967168 }
 0x4a6   :  { %2594 = vsyncpa [#allocation3], 1 }
 0x4a7   :  { %2595 = vsyncpa [#allocation7], 1 }
 0x4a8   :  { %2596 = vsyncpa [#allocation10], 1 }
 0x4a9   :  { %2597 = vsyncpa [#allocation13], 1 }
 0x4aa   :  { %2598 = vsyncpa [#allocation16], 1 }
 0x4ab   :  { %2599 = vsyncpa [#allocation4], 1 }
 0x4ac   :  { %2600 = vsyncpa [#allocation5], 1 }
 0x4ad   :  { %2601 = vsyncpa [#allocation19], 1 }

</bundles_post_ra>
